<compile_context>
chip_gen: v7x
topology: tpu7x:2x2x1
jax: 0.10.0
libtpu: 0.0.40
codegen_flags: <defaults>
</compile_context>

<pallas_src>
import functools

import numpy as np
import jax
import jax.numpy as jnp
from jax import lax
from jax.experimental import pallas as pl
from jax.experimental.pallas import tpu as pltpu

BN_EPS = 1e-5   # nn.BatchNorm1d default eps


# ---------------------------------------------------------------------------
# Fused kernel: Conv1d (K taps) + folded BN1d + ReLU + optional max_pool1d
# ---------------------------------------------------------------------------
def _leenet_conv_block_kernel(x_ref, w_ref, b_ref, o_ref, *,
                              K, S, P, C_in, L_out, pool_pad, TM):
    """Fused block (all loops are static Python -> fully unrolled).

    x_ref : (B_blk, Lq, P*S*C_in)  bf16 zero-padded input, phase-decomposed over P*S
    w_ref : (K*C_in, C_out)        bf16 conv taps with the BN scale already folded in
    b_ref : (1, C_out)             f32 folded BatchNorm bias
    o_ref : (B_blk, Lp_out, C_out) output (bf16 by default)
    """
    G = P * S
    B_blk, Lp_out, C_out = o_ref.shape
    bias = b_ref[...]                                   # loaded once, broadcast in the add

    for b in range(B_blk):                              # batch inside the block (v5e/v6e path)
        for m0 in range(0, Lp_out, TM):                 # M tiles cap accumulator vreg pressure
            tm = min(TM, Lp_out - m0)
            result = None
            for p in range(P):                          # pool-window offset (P == 1 -> no pooling)
                acc = jnp.zeros((tm, C_out), jnp.float32)
                k = 0
                while k < K:                            # conv taps, merged per phase row
                    off = p * S + k
                    a, r = divmod(off, G)
                    n = min(K - k, G - r)               # consecutive taps sharing phase row `a`
                    xs = x_ref[b, a + m0:a + m0 + tm, r * C_in:(r + n) * C_in]
                    ws = w_ref[k * C_in:(k + n) * C_in, :]
                    acc = acc + jnp.dot(xs, ws, preferred_element_type=jnp.float32)
                    k += n
                y = jnp.maximum(acc + bias, 0.0)        # folded BN bias + relu_
                if P > 1:
                    # Row q of this branch is the conv output at t = (q+m0)*P + p - pool_pad.
                    # Values are post-ReLU (>= 0) and every pool window with pool_pad = P//2
                    # contains >= 1 valid conv row, so masking out-of-range rows to 0 is
                    # exactly equivalent to PyTorch's -inf max-pool padding.  Do NOT change
                    # the padding scheme without revisiting this.
                    t = (lax.broadcasted_iota(jnp.int32, (tm, C_out), 0) + m0) * P + (p - pool_pad)
                    y = jnp.where((t >= 0) & (t < L_out), y, 0.0)
                    result = y if result is None else jnp.maximum(result, y)
                else:
                    result = y
            o_ref[b, m0:m0 + tm, :] = result.astype(o_ref.dtype)


def _multi_tensorcore():
    """True on chips with >1 TensorCore (v7x) where a per-batch parallel grid pays off."""
    try:
        kind = jax.devices()[0].device_kind.lower()
    except Exception:
        return False
    return ("v7" in kind) or ("tpu7" in kind) or ("7x" in kind)


# ---------------------------------------------------------------------------
# Channels-last core (block-to-block interface: no transposes)
# ---------------------------------------------------------------------------
def leenet_conv_block_cl(x_cl, w_taps, bn_scale, bn_bias, *, stride=1, pool_size=1,
                         out_dtype=jnp.bfloat16):
    """Eval-mode LeeNetConvBlock, channels-last.  x_cl: (B, L, C_in) -> (B, L', C_out).

    Chain consecutive LeeNet blocks through this function; use `leenet_conv_block`
    only at the PyTorch-layout model boundary.
    """
    K, C_in, C_out = w_taps.shape
    S, P = int(stride), int(pool_size)
    B, L, Cx = x_cl.shape
    assert Cx == C_in
    conv_pad = K // 2
    pool_pad = P // 2
    assert pool_pad < P                                 # guarantees >=1 valid row per pool window
    L_out = (L + 2 * conv_pad - K) // S + 1             # Conv1d output length
    Lp_out = (L_out + 2 * pool_pad - P) // P + 1        # max_pool1d output length (== L_out if P == 1)
    G = P * S                                           # combined phase stride
    a_max = ((P - 1) * S + (K - 1)) // G                # max row offset needed in phase layout
    Lq = Lp_out + a_max
    total = Lq * G
    left = pool_pad * S + conv_pad                      # zeros covering conv + pool left edges

    # bf16 cast + zero-pad + phase-decompose time over stride P*S in ONE fused XLA pass,
    # so every in-kernel access becomes a static stride-1 slice on bf16 data.
    xt = jnp.pad(x_cl.astype(jnp.bfloat16),
                 ((0, 0), (left, max(total - left - L, 0)), (0, 0)))[:, :total, :]
    xq = xt.reshape(B, Lq, G * C_in)

    # Fold the eval-mode BN scale into the conv weights; flatten tap-major so consecutive
    # taps in the same phase row become one contiguous, wider MXU contraction.
    w_flat = (w_taps.astype(jnp.float32) * bn_scale.astype(jnp.float32)[None, None, :]
              ).reshape(K * C_in, C_out).astype(jnp.bfloat16)
    bias = bn_bias.reshape(1, C_out).astype(jnp.float32)

    # Chip-aware batch grid: v7x (2 TCs) -> one batch per grid step, "parallel";
    # single-TC v5e/v6e -> a single grid step with the whole batch inside the block.
    multi_tc = _multi_tensorcore()
    num_steps = B if (multi_tc and B > 1) else 1
    B_blk = B // num_steps
    assert B_blk * num_steps == B
    TM = min(128, Lp_out)                               # M tile for the f32 accumulator

    # TODO(synk): for realistic LeeNet waveform lengths, add an L-tile grid axis with a
    # (K-1)*S-row halo instead of whole-per-batch blocks (v7x VMEM is 64 MiB).
    kern = functools.partial(_leenet_conv_block_kernel, K=K, S=S, P=P, C_in=C_in,
                             L_out=L_out, pool_pad=pool_pad, TM=TM)
    y = pl.pallas_call(
        kern,
        out_shape=jax.ShapeDtypeStruct((B, Lp_out, C_out), out_dtype),
        grid=(num_steps,),
        in_specs=[
            pl.BlockSpec((B_blk, Lq, G * C_in), lambda g: (g, 0, 0)),   # bf16 activations
            pl.BlockSpec((K * C_in, C_out), lambda g: (0, 0)),          # bf16 folded weights
            pl.BlockSpec((1, C_out), lambda g: (0, 0)),                 # f32 folded BN bias
        ],
        out_specs=pl.BlockSpec((B_blk, Lp_out, C_out), lambda g: (g, 0, 0)),
        compiler_params=pltpu.CompilerParams(
            dimension_semantics=(("parallel",) if num_steps > 1 else ("arbitrary",))),
    )(xq, w_flat, bias)
    return y


# ---------------------------------------------------------------------------
# PyTorch-layout boundary wrapper: (B, C_in, L) -> (B, C_out, L')
# ---------------------------------------------------------------------------
def leenet_conv_block(x, w_taps, bn_scale, bn_bias, *, stride=1, pool_size=1,
                      out_dtype=jnp.bfloat16):
    x_cl = jnp.transpose(x, (0, 2, 1))                  # only at the model boundary
    y_cl = leenet_conv_block_cl(x_cl, w_taps, bn_scale, bn_bias,
                                stride=stride, pool_size=pool_size, out_dtype=out_dtype)
    return jnp.transpose(y_cl, (0, 2, 1))


# ---------------------------------------------------------------------------
# Pure-JAX f32 reference (for the correctness check)
# ---------------------------------------------------------------------------
def leenet_conv_block_reference(x, w_taps, bn_scale, bn_bias, *, stride=1, pool_size=1):
    K, C_in, C_out = w_taps.shape
    S, P = int(stride), int(pool_size)
    B, _, L = x.shape
    conv_pad = K // 2
    L_out = (L + 2 * conv_pad - K) // S + 1
    xp = jnp.pad(x.astype(jnp.float32), ((0, 0), (0, 0), (conv_pad, conv_pad)))
    idx = np.arange(L_out)[:, None] * S + np.arange(K)[None, :]          # (L_out, K)
    cols = xp[:, :, idx]                                                 # (B, C_in, L_out, K)
    y = jnp.einsum('bclk,kcd->bld', cols, w_taps.astype(jnp.float32))
    y = jnp.maximum(y * bn_scale[None, None, :] + bn_bias[None, None, :], 0.0)
    if P != 1:
        pool_pad = P // 2
        y = lax.reduce_window(y, -jnp.inf, lax.max,
                              window_dimensions=(1, P, 1),
                              window_strides=(1, P, 1),
                              padding=((0, 0), (pool_pad, pool_pad), (0, 0)))
    return jnp.transpose(y, (0, 2, 1))


# ---------------------------------------------------------------------------
if __name__ == "__main__":
    # Small shapes consistent with LeeNet blocks (e.g. LeeNetConvBlock(64, 128, 3, stride)).
    B, C_in, C_out, K, L = 2, 64, 128, 3, 256

    key = jax.random.PRNGKey(0)
    kx, kw, kg, kb, km, kv = jax.random.split(key, 6)
    x = jax.random.normal(kx, (B, C_in, L), dtype=jnp.float32)

    # Conv1d weight (bias=False).  PyTorch layout (C_out, C_in, K) -> tap-major (K, C_in, C_out).
    w_pt = jax.random.normal(kw, (C_out, C_in, K), dtype=jnp.float32) * (2.0 / (C_in * K)) ** 0.5
    w_taps = jnp.transpose(w_pt, (2, 1, 0))

    # Eval-mode BatchNorm1d folded into a per-channel affine.
    gamma = 1.0 + 0.1 * jax.random.normal(kg, (C_out,), dtype=jnp.float32)
    beta = 0.1 * jax.random.normal(kb, (C_out,), dtype=jnp.float32)
    rmean = 0.05 * jax.random.normal(km, (C_out,), dtype=jnp.float32)
    rvar = 1.0 + 0.1 * jax.random.uniform(kv, (C_out,), dtype=jnp.float32)
    bn_scale = gamma / jnp.sqrt(rvar + BN_EPS)
    bn_bias = beta - rmean * bn_scale

    # Case 1: default forward (stride=1, pool_size=1 -> no pooling).
    out1 = leenet_conv_block(x, w_taps, bn_scale, bn_bias, stride=1, pool_size=1)
    jax.block_until_ready(out1)
    ref1 = leenet_conv_block_reference(x, w_taps, bn_scale, bn_bias, stride=1, pool_size=1)
    assert out1.shape == ref1.shape == (B, C_out, L)
    assert bool(jnp.all(jnp.isfinite(out1.astype(jnp.float32))))
    assert float(jnp.max(jnp.abs(out1.astype(jnp.float32) - ref1))) < 0.1

    # Case 2: strided conv + max pooling (stride=2, pool_size=3).
    out2 = leenet_conv_block(x, w_taps, bn_scale, bn_bias, stride=2, pool_size=3)
    jax.block_until_ready(out2)
    ref2 = leenet_conv_block_reference(x, w_taps, bn_scale, bn_bias, stride=2, pool_size=3)
    assert out2.shape == ref2.shape == (B, C_out, 43)
    assert bool(jnp.all(jnp.isfinite(out2.astype(jnp.float32))))
    assert float(jnp.max(jnp.abs(out2.astype(jnp.float32) - ref2))) < 0.1

    print("KERNEL_OK")
</pallas_src>

<mosaic_0001>
module attributes {stable_mosaic.version = 11 : i64} {
  func.func @_leenet_conv_block_kernel(%arg0: i32, %arg1: memref<2x258x64xbf16, #tpu.memory_space<vmem>>, %arg2: memref<192x128xbf16, #tpu.memory_space<vmem>>, %arg3: memref<1x128xf32, #tpu.memory_space<vmem>>, %arg4: memref<2x256x128xbf16, #tpu.memory_space<vmem>>) attributes {dimension_semantics = [#tpu.dimension_semantics<arbitrary>], iteration_bounds = array<i64: 1>, scalar_prefetch = 0 : i64, scratch_operands = 0 : i64, tpu.core_type = #tpu.core_type<tc>, window_params = [{transform_indices = @transform_0, window_bounds = array<i64: 2, 258, 64>}, {pipeline_mode = #tpu.pipeline_mode<synchronous>, transform_indices = @transform_1, window_bounds = array<i64: 192, 128>}, {pipeline_mode = #tpu.pipeline_mode<synchronous>, transform_indices = @transform_2, window_bounds = array<i64: 1, 128>}, {transform_indices = @transform_3, window_bounds = array<i64: 2, 256, 128>}]} {
    %c0 = arith.constant 0 : index
    %c0_0 = arith.constant 0 : index
    %0 = vector.load %arg3[%c0, %c0_0] : memref<1x128xf32, #tpu.memory_space<vmem>>, vector<1x128xf32>
    %cst = arith.constant 0.000000e+00 : f32
    %1 = vector.broadcast %cst : f32 to vector<128x128xf32>
    %c0_1 = arith.constant 0 : index
    %c0_2 = arith.constant 0 : index
    %c0_3 = arith.constant 0 : index
    %2 = vector.load %arg1[%c0_1, %c0_2, %c0_3] : memref<2x258x64xbf16, #tpu.memory_space<vmem>>, vector<1x128x64xbf16>
    %3 = vector.shape_cast %2 : vector<1x128x64xbf16> to vector<128x64xbf16>
    %c0_4 = arith.constant 0 : index
    %c0_5 = arith.constant 0 : index
    %4 = vector.load %arg2[%c0_4, %c0_5] : memref<192x128xbf16, #tpu.memory_space<vmem>>, vector<64x128xbf16>
    %cst_6 = arith.constant dense<0.000000e+00> : vector<128x128xf32>
    %5 = tpu.matmul %3, %4, %cst_6 {dimension_numbers = #tpu.dot_dimension_numbers<[1], [0], [0], [1], [0, 0, 1, 1], [], []>} : vector<128x64xbf16>, vector<64x128xbf16>, vector<128x128xf32> -> vector<128x128xf32>
    %6 = arith.addf %1, %5 : vector<128x128xf32>
    %c0_7 = arith.constant 0 : index
    %c1 = arith.constant 1 : index
    %c0_8 = arith.constant 0 : index
    %7 = vector.load %arg1[%c0_7, %c1, %c0_8] : memref<2x258x64xbf16, #tpu.memory_space<vmem>>, vector<1x128x64xbf16>
    %8 = vector.shape_cast %7 : vector<1x128x64xbf16> to vector<128x64xbf16>
    %c64 = arith.constant 64 : index
    %c0_9 = arith.constant 0 : index
    %9 = vector.load %arg2[%c64, %c0_9] : memref<192x128xbf16, #tpu.memory_space<vmem>>, vector<64x128xbf16>
    %cst_10 = arith.constant dense<0.000000e+00> : vector<128x128xf32>
    %10 = tpu.matmul %8, %9, %cst_10 {dimension_numbers = #tpu.dot_dimension_numbers<[1], [0], [0], [1], [0, 0, 1, 1], [], []>} : vector<128x64xbf16>, vector<64x128xbf16>, vector<128x128xf32> -> vector<128x128xf32>
    %11 = arith.addf %6, %10 : vector<128x128xf32>
    %c0_11 = arith.constant 0 : index
    %c2 = arith.constant 2 : index
    %c0_12 = arith.constant 0 : index
    %12 = vector.load %arg1[%c0_11, %c2, %c0_12] : memref<2x258x64xbf16, #tpu.memory_space<vmem>>, vector<1x128x64xbf16>
    %13 = vector.shape_cast %12 : vector<1x128x64xbf16> to vector<128x64xbf16>
    %c128 = arith.constant 128 : index
    %c0_13 = arith.constant 0 : index
    %14 = vector.load %arg2[%c128, %c0_13] : memref<192x128xbf16, #tpu.memory_space<vmem>>, vector<64x128xbf16>
    %cst_14 = arith.constant dense<0.000000e+00> : vector<128x128xf32>
    %15 = tpu.matmul %13, %14, %cst_14 {dimension_numbers = #tpu.dot_dimension_numbers<[1], [0], [0], [1], [0, 0, 1, 1], [], []>} : vector<128x64xbf16>, vector<64x128xbf16>, vector<128x128xf32> -> vector<128x128xf32>
    %16 = arith.addf %11, %15 : vector<128x128xf32>
    %17 = vector.broadcast %0 : vector<1x128xf32> to vector<128x128xf32>
    %18 = arith.addf %16, %17 : vector<128x128xf32>
    %cst_15 = arith.constant 0.000000e+00 : f32
    %19 = vector.broadcast %cst_15 : f32 to vector<128x128xf32>
    %20 = arith.maximumf %18, %19 : vector<128x128xf32>
    %21 = arith.truncf %20 : vector<128x128xf32> to vector<128x128xbf16>
    %c0_16 = arith.constant 0 : index
    %c0_17 = arith.constant 0 : index
    %c0_18 = arith.constant 0 : index
    %22 = vector.load %arg4[%c0_16, %c0_17, %c0_18] : memref<2x256x128xbf16, #tpu.memory_space<vmem>>, vector<1x128x128xbf16>
    %23 = vector.shape_cast %22 : vector<1x128x128xbf16> to vector<128x128xbf16>
    %24 = vector.shape_cast %21 : vector<128x128xbf16> to vector<1x128x128xbf16>
    tpu.vector_store %arg4[%c0_16, %c0_17, %c0_18], %24 {strides = array<i32>} : memref<2x256x128xbf16, #tpu.memory_space<vmem>>, vector<1x128x128xbf16>,
    %cst_19 = arith.constant 0.000000e+00 : f32
    %25 = vector.broadcast %cst_19 : f32 to vector<128x128xf32>
    %c0_20 = arith.constant 0 : index
    %c128_21 = arith.constant 128 : index
    %c0_22 = arith.constant 0 : index
    %26 = vector.load %arg1[%c0_20, %c128_21, %c0_22] : memref<2x258x64xbf16, #tpu.memory_space<vmem>>, vector<1x128x64xbf16>
    %27 = vector.shape_cast %26 : vector<1x128x64xbf16> to vector<128x64xbf16>
    %c0_23 = arith.constant 0 : index
    %c0_24 = arith.constant 0 : index
    %28 = vector.load %arg2[%c0_23, %c0_24] : memref<192x128xbf16, #tpu.memory_space<vmem>>, vector<64x128xbf16>
    %cst_25 = arith.constant dense<0.000000e+00> : vector<128x128xf32>
    %29 = tpu.matmul %27, %28, %cst_25 {dimension_numbers = #tpu.dot_dimension_numbers<[1], [0], [0], [1], [0, 0, 1, 1], [], []>} : vector<128x64xbf16>, vector<64x128xbf16>, vector<128x128xf32> -> vector<128x128xf32>
    %30 = arith.addf %25, %29 : vector<128x128xf32>
    %c0_26 = arith.constant 0 : index
    %c129 = arith.constant 129 : index
    %c0_27 = arith.constant 0 : index
    %31 = vector.load %arg1[%c0_26, %c129, %c0_27] : memref<2x258x64xbf16, #tpu.memory_space<vmem>>, vector<1x128x64xbf16>
    %32 = vector.shape_cast %31 : vector<1x128x64xbf16> to vector<128x64xbf16>
    %c64_28 = arith.constant 64 : index
    %c0_29 = arith.constant 0 : index
    %33 = vector.load %arg2[%c64_28, %c0_29] : memref<192x128xbf16, #tpu.memory_space<vmem>>, vector<64x128xbf16>
    %cst_30 = arith.constant dense<0.000000e+00> : vector<128x128xf32>
    %34 = tpu.matmul %32, %33, %cst_30 {dimension_numbers = #tpu.dot_dimension_numbers<[1], [0], [0], [1], [0, 0, 1, 1], [], []>} : vector<128x64xbf16>, vector<64x128xbf16>, vector<128x128xf32> -> vector<128x128xf32>
    %35 = arith.addf %30, %34 : vector<128x128xf32>
    %c0_31 = arith.constant 0 : index
    %c130 = arith.constant 130 : index
    %c0_32 = arith.constant 0 : index
    %36 = vector.load %arg1[%c0_31, %c130, %c0_32] : memref<2x258x64xbf16, #tpu.memory_space<vmem>>, vector<1x128x64xbf16>
    %37 = vector.shape_cast %36 : vector<1x128x64xbf16> to vector<128x64xbf16>
    %c128_33 = arith.constant 128 : index
    %c0_34 = arith.constant 0 : index
    %38 = vector.load %arg2[%c128_33, %c0_34] : memref<192x128xbf16, #tpu.memory_space<vmem>>, vector<64x128xbf16>
    %cst_35 = arith.constant dense<0.000000e+00> : vector<128x128xf32>
    %39 = tpu.matmul %37, %38, %cst_35 {dimension_numbers = #tpu.dot_dimension_numbers<[1], [0], [0], [1], [0, 0, 1, 1], [], []>} : vector<128x64xbf16>, vector<64x128xbf16>, vector<128x128xf32> -> vector<128x128xf32>
    %40 = arith.addf %35, %39 : vector<128x128xf32>
    %41 = vector.broadcast %0 : vector<1x128xf32> to vector<128x128xf32>
    %42 = arith.addf %40, %41 : vector<128x128xf32>
    %cst_36 = arith.constant 0.000000e+00 : f32
    %43 = vector.broadcast %cst_36 : f32 to vector<128x128xf32>
    %44 = arith.maximumf %42, %43 : vector<128x128xf32>
    %45 = arith.truncf %44 : vector<128x128xf32> to vector<128x128xbf16>
    %c0_37 = arith.constant 0 : index
    %c128_38 = arith.constant 128 : index
    %c0_39 = arith.constant 0 : index
    %46 = vector.load %arg4[%c0_37, %c128_38, %c0_39] : memref<2x256x128xbf16, #tpu.memory_space<vmem>>, vector<1x128x128xbf16>
    %47 = vector.shape_cast %46 : vector<1x128x128xbf16> to vector<128x128xbf16>
    %48 = vector.shape_cast %45 : vector<128x128xbf16> to vector<1x128x128xbf16>
    tpu.vector_store %arg4[%c0_37, %c128_38, %c0_39], %48 {strides = array<i32>} : memref<2x256x128xbf16, #tpu.memory_space<vmem>>, vector<1x128x128xbf16>,
    %cst_40 = arith.constant 0.000000e+00 : f32
    %49 = vector.broadcast %cst_40 : f32 to vector<128x128xf32>
    %c1_41 = arith.constant 1 : index
    %c0_42 = arith.constant 0 : index
    %c0_43 = arith.constant 0 : index
    %50 = vector.load %arg1[%c1_41, %c0_42, %c0_43] : memref<2x258x64xbf16, #tpu.memory_space<vmem>>, vector<1x128x64xbf16>
    %51 = vector.shape_cast %50 : vector<1x128x64xbf16> to vector<128x64xbf16>
    %c0_44 = arith.constant 0 : index
    %c0_45 = arith.constant 0 : index
    %52 = vector.load %arg2[%c0_44, %c0_45] : memref<192x128xbf16, #tpu.memory_space<vmem>>, vector<64x128xbf16>
    %cst_46 = arith.constant dense<0.000000e+00> : vector<128x128xf32>
    %53 = tpu.matmul %51, %52, %cst_46 {dimension_numbers = #tpu.dot_dimension_numbers<[1], [0], [0], [1], [0, 0, 1, 1], [], []>} : vector<128x64xbf16>, vector<64x128xbf16>, vector<128x128xf32> -> vector<128x128xf32>
    %54 = arith.addf %49, %53 : vector<128x128xf32>
    %c1_47 = arith.constant 1 : index
    %c1_48 = arith.constant 1 : index
    %c0_49 = arith.constant 0 : index
    %55 = vector.load %arg1[%c1_47, %c1_48, %c0_49] : memref<2x258x64xbf16, #tpu.memory_space<vmem>>, vector<1x128x64xbf16>
    %56 = vector.shape_cast %55 : vector<1x128x64xbf16> to vector<128x64xbf16>
    %c64_50 = arith.constant 64 : index
    %c0_51 = arith.constant 0 : index
    %57 = vector.load %arg2[%c64_50, %c0_51] : memref<192x128xbf16, #tpu.memory_space<vmem>>, vector<64x128xbf16>
    %cst_52 = arith.constant dense<0.000000e+00> : vector<128x128xf32>
    %58 = tpu.matmul %56, %57, %cst_52 {dimension_numbers = #tpu.dot_dimension_numbers<[1], [0], [0], [1], [0, 0, 1, 1], [], []>} : vector<128x64xbf16>, vector<64x128xbf16>, vector<128x128xf32> -> vector<128x128xf32>
    %59 = arith.addf %54, %58 : vector<128x128xf32>
    %c1_53 = arith.constant 1 : index
    %c2_54 = arith.constant 2 : index
    %c0_55 = arith.constant 0 : index
    %60 = vector.load %arg1[%c1_53, %c2_54, %c0_55] : memref<2x258x64xbf16, #tpu.memory_space<vmem>>, vector<1x128x64xbf16>
    %61 = vector.shape_cast %60 : vector<1x128x64xbf16> to vector<128x64xbf16>
    %c128_56 = arith.constant 128 : index
    %c0_57 = arith.constant 0 : index
    %62 = vector.load %arg2[%c128_56, %c0_57] : memref<192x128xbf16, #tpu.memory_space<vmem>>, vector<64x128xbf16>
    %cst_58 = arith.constant dense<0.000000e+00> : vector<128x128xf32>
    %63 = tpu.matmul %61, %62, %cst_58 {dimension_numbers = #tpu.dot_dimension_numbers<[1], [0], [0], [1], [0, 0, 1, 1], [], []>} : vector<128x64xbf16>, vector<64x128xbf16>, vector<128x128xf32> -> vector<128x128xf32>
    %64 = arith.addf %59, %63 : vector<128x128xf32>
    %65 = vector.broadcast %0 : vector<1x128xf32> to vector<128x128xf32>
    %66 = arith.addf %64, %65 : vector<128x128xf32>
    %cst_59 = arith.constant 0.000000e+00 : f32
    %67 = vector.broadcast %cst_59 : f32 to vector<128x128xf32>
    %68 = arith.maximumf %66, %67 : vector<128x128xf32>
    %69 = arith.truncf %68 : vector<128x128xf32> to vector<128x128xbf16>
    %c1_60 = arith.constant 1 : index
    %c0_61 = arith.constant 0 : index
    %c0_62 = arith.constant 0 : index
    %70 = vector.load %arg4[%c1_60, %c0_61, %c0_62] : memref<2x256x128xbf16, #tpu.memory_space<vmem>>, vector<1x128x128xbf16>
    %71 = vector.shape_cast %70 : vector<1x128x128xbf16> to vector<128x128xbf16>
    %72 = vector.shape_cast %69 : vector<128x128xbf16> to vector<1x128x128xbf16>
    tpu.vector_store %arg4[%c1_60, %c0_61, %c0_62], %72 {strides = array<i32>} : memref<2x256x128xbf16, #tpu.memory_space<vmem>>, vector<1x128x128xbf16>,
    %cst_63 = arith.constant 0.000000e+00 : f32
    %73 = vector.broadcast %cst_63 : f32 to vector<128x128xf32>
    %c1_64 = arith.constant 1 : index
    %c128_65 = arith.constant 128 : index
    %c0_66 = arith.constant 0 : index
    %74 = vector.load %arg1[%c1_64, %c128_65, %c0_66] : memref<2x258x64xbf16, #tpu.memory_space<vmem>>, vector<1x128x64xbf16>
    %75 = vector.shape_cast %74 : vector<1x128x64xbf16> to vector<128x64xbf16>
    %c0_67 = arith.constant 0 : index
    %c0_68 = arith.constant 0 : index
    %76 = vector.load %arg2[%c0_67, %c0_68] : memref<192x128xbf16, #tpu.memory_space<vmem>>, vector<64x128xbf16>
    %cst_69 = arith.constant dense<0.000000e+00> : vector<128x128xf32>
    %77 = tpu.matmul %75, %76, %cst_69 {dimension_numbers = #tpu.dot_dimension_numbers<[1], [0], [0], [1], [0, 0, 1, 1], [], []>} : vector<128x64xbf16>, vector<64x128xbf16>, vector<128x128xf32> -> vector<128x128xf32>
    %78 = arith.addf %73, %77 : vector<128x128xf32>
    %c1_70 = arith.constant 1 : index
    %c129_71 = arith.constant 129 : index
    %c0_72 = arith.constant 0 : index
    %79 = vector.load %arg1[%c1_70, %c129_71, %c0_72] : memref<2x258x64xbf16, #tpu.memory_space<vmem>>, vector<1x128x64xbf16>
    %80 = vector.shape_cast %79 : vector<1x128x64xbf16> to vector<128x64xbf16>
    %c64_73 = arith.constant 64 : index
    %c0_74 = arith.constant 0 : index
    %81 = vector.load %arg2[%c64_73, %c0_74] : memref<192x128xbf16, #tpu.memory_space<vmem>>, vector<64x128xbf16>
    %cst_75 = arith.constant dense<0.000000e+00> : vector<128x128xf32>
    %82 = tpu.matmul %80, %81, %cst_75 {dimension_numbers = #tpu.dot_dimension_numbers<[1], [0], [0], [1], [0, 0, 1, 1], [], []>} : vector<128x64xbf16>, vector<64x128xbf16>, vector<128x128xf32> -> vector<128x128xf32>
    %83 = arith.addf %78, %82 : vector<128x128xf32>
    %c1_76 = arith.constant 1 : index
    %c130_77 = arith.constant 130 : index
    %c0_78 = arith.constant 0 : index
    %84 = vector.load %arg1[%c1_76, %c130_77, %c0_78] : memref<2x258x64xbf16, #tpu.memory_space<vmem>>, vector<1x128x64xbf16>
    %85 = vector.shape_cast %84 : vector<1x128x64xbf16> to vector<128x64xbf16>
    %c128_79 = arith.constant 128 : index
    %c0_80 = arith.constant 0 : index
    %86 = vector.load %arg2[%c128_79, %c0_80] : memref<192x128xbf16, #tpu.memory_space<vmem>>, vector<64x128xbf16>
    %cst_81 = arith.constant dense<0.000000e+00> : vector<128x128xf32>
    %87 = tpu.matmul %85, %86, %cst_81 {dimension_numbers = #tpu.dot_dimension_numbers<[1], [0], [0], [1], [0, 0, 1, 1], [], []>} : vector<128x64xbf16>, vector<64x128xbf16>, vector<128x128xf32> -> vector<128x128xf32>
    %88 = arith.addf %83, %87 : vector<128x128xf32>
    %89 = vector.broadcast %0 : vector<1x128xf32> to vector<128x128xf32>
    %90 = arith.addf %88, %89 : vector<128x128xf32>
    %cst_82 = arith.constant 0.000000e+00 : f32
    %91 = vector.broadcast %cst_82 : f32 to vector<128x128xf32>
    %92 = arith.maximumf %90, %91 : vector<128x128xf32>
    %93 = arith.truncf %92 : vector<128x128xf32> to vector<128x128xbf16>
    %c1_83 = arith.constant 1 : index
    %c128_84 = arith.constant 128 : index
    %c0_85 = arith.constant 0 : index
    %94 = vector.load %arg4[%c1_83, %c128_84, %c0_85] : memref<2x256x128xbf16, #tpu.memory_space<vmem>>, vector<1x128x128xbf16>
    %95 = vector.shape_cast %94 : vector<1x128x128xbf16> to vector<128x128xbf16>
    %96 = vector.shape_cast %93 : vector<128x128xbf16> to vector<1x128x128xbf16>
    tpu.vector_store %arg4[%c1_83, %c128_84, %c0_85], %96 {strides = array<i32>} : memref<2x256x128xbf16, #tpu.memory_space<vmem>>, vector<1x128x128xbf16>,
    return
  }
  func.func @transform_0(%arg0: i32) -> (i32, i32, i32) {
    %c0_i32 = arith.constant 0 : i32
    %c0_i32_0 = arith.constant 0 : i32
    %c0_i32_1 = arith.constant 0 : i32
    return %arg0, %c0_i32, %c0_i32_0 : i32, i32, i32
  }
  func.func @transform_1(%arg0: i32) -> (i32, i32) {
    %c0_i32 = arith.constant 0 : i32
    %c0_i32_0 = arith.constant 0 : i32
    %c0_i32_1 = arith.constant 0 : i32
    return %c0_i32, %c0_i32_0 : i32, i32
  }
  func.func @transform_2(%arg0: i32) -> (i32, i32) {
    %c0_i32 = arith.constant 0 : i32
    %c0_i32_0 = arith.constant 0 : i32
    %c0_i32_1 = arith.constant 0 : i32
    return %c0_i32, %c0_i32_0 : i32, i32
  }
  func.func @transform_3(%arg0: i32) -> (i32, i32, i32) {
    %c0_i32 = arith.constant 0 : i32
    %c0_i32_0 = arith.constant 0 : i32
    %c0_i32_1 = arith.constant 0 : i32
    return %arg0, %c0_i32, %c0_i32_0 : i32, i32, i32
  }
}

</mosaic_0001>

<bundles_post_ra>
// kernel: tpu_custom_call.1
= control target key start
LH: loop header
LB: loop body
LE: loop exit
PB: predicated region body
PF: predicated region fallthrough
CT: control target
= control target key end

     0   :  { %vm186_vm0 = vcmask 523264   ;;  %vm93_vm1 = vsmask.f32 7424  ;;  %vm457_vm2 = vcmask 1046528   ;;  %s5002_s0 = inlined_call_operand.vmem [shape: bf16[2,258,64], index: 0, kind: input, shape index: {}]   ;;  %s5003_s1 = inlined_call_operand.vmem [shape: bf16[192,128], index: 1, kind: input, shape index: {}]   ;;  %s5004_s2 = inlined_call_operand.vmem [shape: f32[1,128], index: 2, kind: input, shape index: {}]   ;;  %s5005_s3 = inlined_call_operand.hbm [shape: bf16[2,256,128], index: 3, kind: output, shape index: {}]  }
   0x1   :  { %v4058_v0 = vld [vmem:[%s5003_s1 + $0x20] sm:$0xff]   ;;  %v4060_v2 = vld [vmem:[%s5003_s1 + $0x28] sm:$0xff]   ;;  %v4062_v4 = vld [vmem:[%s5003_s1 + $0x30] sm:$0xff]  }
   0x2   :  { %v4059_v1 = vld [vmem:[%s5003_s1 + $0x20] sm:$0xff]   ;;  %3639 = vmatprep.subr.bf16.mxu0 %v4058_v0  ;;  %v4061_v3 = vld [vmem:[%s5003_s1 + $0x28] sm:$0xff]   ;;  %v4063_v5 = vld [vmem:[%s5003_s1 + $0x30] sm:$0xff]  }
   0x3   :  { %3711 = vmatprep.subr.bf16.mxu1 %v4059_v1  ;;  %3640 = vmatpush3.bf16.msra.mxu0 %v4058_v0  ;;  %v4064_v6 = vld [vmem:[%s5003_s1 + $0x38] sm:$0xff]   ;;  %v17_v8 = vld [vmem:[%s5002_s0] sm:$0xf]  ;;  %v4223_v9 = vld [vmem:[%s5002_s0 + $0x4] sm:$0xf] }
   0x4   :  { %3712 = vmatpush3.bf16.msra.mxu1 %v4059_v1  ;;  %3641 = vmatprep.subr.bf16.mxu0 %v4060_v2  ;;  %v4065_v7 = vld [vmem:[%s5003_s1 + $0x38] sm:$0xff]   ;;  %v4226_v10 = vcombine.low %v17_v8, %v4223_v9  ;;  %v4231_v11 = vld [vmem:[%s5002_s0 + $0x8] sm:$0xff]   ;;  %v754_v13 = vld [vmem:[%s5002_s0 + $0x40] sm:$0xf] }
   0x5   :  { %3713 = vmatprep.subr.bf16.mxu1 %v4061_v3  ;;  %v4236_v12 = vld [vmem:[%s5002_s0 + $0x48] sm:$0xff]   ;;  %v4244_v14 = vld [vmem:[%s5002_s0 + $0x44] sm:$0xf]  ;;  %v102_v17 = vshll.u32 %v4231_v11, 16  ;;  %v106_v18 = vshrl.u32 %v4231_v11, 16  ;;  %v4258_v24 = vld [vmem:[%s5002_s0 + $0x10] sm:$0xff]  }
   0x6   :  { %v95_v15 = vshrl.u32 %v4226_v10, 16  ;;  %v97_v16 = vshll.u32 %v4226_v10, 16  ;;  %v4251_v19 = vcombine.low %v754_v13, %v4244_v14  ;;  %v838_v20 = vshll.u32 %v4236_v12, 16  ;;  %v4071_v25 = vld [vmem:[%s5003_s1] sm:$0xff]   ;;  %v4268_v29 = vld [vmem:[%s5002_s0 + $0x50] sm:$0xff]   ;;  %v4279_v39 = vld [vmem:[%s5002_s0 + $0x18] sm:$0xff]  }
   0x7   :  { %3642 = vmatpush3.bf16.msra.mxu0 %v4060_v2  ;;  %v842_v21 = vshrl.u32 %v4236_v12, 16  ;;  %v104_v23 = vrot.slane %v102_v17, 1  ;;  %v110_v32 = vshll.u32 %v4258_v24, 16  ;;  %v4073_v33 = vld [vmem:[%s5003_s1] sm:$0xff]   ;;  %v846_v36 = vshll.u32 %v4268_v29, 16  ;;  %v4288_v45 = vld [vmem:[%s5002_s0 + $0x58] sm:$0xff]  }
   0x8   :  { %3714 = vmatpush3.bf16.msra.mxu1 %v4061_v3  ;;  %3643 = vmatprep.subr.bf16.mxu0 %v4062_v4  ;;  %v99_v22 = vrot.slane %v97_v16, 1  ;;  %v831_v26 = vshrl.u32 %v4251_v19, 16  ;;  %v833_v27 = vshll.u32 %v4251_v19, 16  ;;  %v840_v28 = vrot.slane %v838_v20, 1  ;;  %v4294_v47 = vld [vmem:[%s5002_s0 + $0x20] sm:$0xff]   ;;  %v4077_v52 = vld [vmem:[%s5003_s1 + $0x8] sm:$0xff]  }
   0x9   :  { %3715 = vmatprep.subr.bf16.mxu1 %v4063_v5  ;;  %v108_v31 = vor.u32 %v106_v18, %v104_v23  ;;  %v112_v38 = vrot.slane %v110_v32, 1  ;;  %v848_v41 = vrot.slane %v846_v36, 1  ;;  %v114_v42 = vshrl.u32 %v4258_v24, 16  ;;  %v4309_v57 = vld [vmem:[%s5002_s0 + $0x60] sm:$0xff]   ;;  %v4079_v59 = vld [vmem:[%s5003_s1 + $0x8] sm:$0xff]   ;;  %v4085_v36 = vld [vmem:[%s5003_s1 + $0x10] sm:$0xff]  }
   0xa   :  { %v100_v30 = vor.u32 %v99_v22, %v95_v15  ;;  %v835_v34 = vrot.slane %v833_v27, 1  ;;  %v844_v35 = vor.u32 %v842_v21, %v840_v28  ;;  %v118_v44 = vshll.u32 %v4279_v39, 16  ;;  %v4322_v1 = vld [vmem:[%s5002_s0 + $0x28] sm:$0xff]   ;;  %v4338_v15 = vld [vmem:[%s5002_s0 + $0x30] sm:$0xff]  }
   0xb   :  { %3644 = vmatpush3.bf16.msra.mxu0 %v4062_v4  ;;  %v113_v43 = vsel %vm93_vm1, %v108_v31, %v112_v38  ;;  %v850_v46 = vshrl.u32 %v4268_v29, 16  ;;  %v116_v50 = vor.u32 %v114_v42, %v112_v38  ;;  %v122_v51 = vshrl.u32 %v4279_v39, 16  ;;  %v4373_v42 = vld [vmem:[%s5002_s0 + $0x78] sm:$0xff]  }
   0xc   :  { %3716 = vmatpush3.bf16.msra.mxu1 %v4063_v5  ;;  %3645 = vmatprep.subr.bf16.mxu0 %v4064_v6  ;;  %v105_v37 = vsel %vm93_vm1, %v100_v30, %v104_v23  ;;  %v836_v40 = vor.u32 %v835_v34, %v831_v26  ;;  %v849_v49 = vsel %vm93_vm1, %v844_v35, %v848_v41  ;;  %v120_v53 = vrot.slane %v118_v44, 1  ;;  %v4351_v26 = vld [vmem:[%s5002_s0 + $0x70] sm:$0xff]  }
   0xd   :  { %3717 = vmatprep.subr.bf16.mxu1 %v4065_v7  ;;  %3647 = vmatprep.mubr.msk.bf16.mxu0 %vm186_vm0, %v105_v37  ;;  %v852_v54 = vor.u32 %v850_v46, %v848_v41  ;;  %v854_v55 = vshll.u32 %v4288_v45, 16  ;;  %v126_v56 = vshll.u32 %v4294_v47, 16  ;;  %v858_v58 = vshrl.u32 %v4288_v45, 16 }
   0xe   :  { %v841_v48 = vsel %vm93_vm1, %v836_v40, %v840_v28  ;;  %v121_v60 = vsel %vm93_vm1, %v116_v50, %v120_v53  ;;  %v124_v62 = vor.u32 %v122_v51, %v120_v53  ;;  %v862_v0 = vshll.u32 %v4309_v57, 16  ;;  %v4367_v40 = vld [vmem:[%s5002_s0 + $0x38] sm:$0xff]  }
   0xf   :  { %3646 = vmatpush3.bf16.msra.mxu0 %v4064_v6  ;;  %3719 = vmatprep.mubr.msk.bf16.mxu1 %vm186_vm0, %v841_v48  ;;  %v856_v61 = vrot.slane %v854_v55, 1  ;;  %v128_v63 = vrot.slane %v126_v56, 1  ;;  %v130_v5 = vshrl.u32 %v4294_v47, 16  ;;  %v4330_v6 = vld [vmem:[%s5002_s0 + $0x68] sm:$0xff]   ;;  %v134_v8 = vshll.u32 %v4322_v1, 16  ;;  %v4089_v50 = vld [vmem:[%s5003_s1 + $0x18] sm:$0xff]  }
  0x10   :  { %3718 = vmatpush3.bf16.msra.mxu1 %v4065_v7  ;;  %3663 = vmatprep.subr.bf16.mxu0 %v4071_v25  ;;  %v864_v7 = vrot.slane %v862_v0, 1  ;;  %v866_v13 = vshrl.u32 %v4309_v57, 16  ;;  %v870_v17 = vshll.u32 %v4330_v6, 16  ;;  %v138_v18 = vshrl.u32 %v4322_v1, 16 }
  0x11   :  { %3735 = vmatprep.subr.bf16.mxu1 %v4073_v33  ;;  %v857_v2 = vsel %vm93_vm1, %v852_v54, %v856_v61  ;;  %v129_v3 = vsel %vm93_vm1, %v124_v62, %v128_v63  ;;  %v860_v4 = vor.u32 %v858_v58, %v856_v61  ;;  %v132_v16 = vor.u32 %v130_v5, %v128_v63  ;;  %v4380_v48 = vld [vmem:[%s5002_s0 + $0x40] ss:$0 sps:$4 sm:$0x11]  }
  0x12   :  { %3648 = vmatmul.mubr.msk.bf16.vlgmr.msra.gmra.mrb[0].mxu0 %vm186_vm0, %v113_v43  ;;  %v136_v21 = vrot.slane %v134_v8, 1  ;;  %v868_v22 = vor.u32 %v866_v13, %v864_v7  ;;  %v142_v23 = vshll.u32 %v4338_v15, 16  ;;  %v872_v27 = vrot.slane %v870_v17, 1  ;;  %v4394_v58 = vld [vmem:[%s5002_s0 + $0x80] ss:$0 sps:$4 sm:$0x11]  }
  0x13   :  { %3664 = vmatpush3.bf16.msra.mxu0 %v4071_v25  ;;  %3720 = vmatmul.mubr.msk.bf16.vlgmr.msra.gmra.mrb[0].mxu1 %vm186_vm0, %v849_v49  ;;  %v865_v20 = vsel %vm93_vm1, %v860_v4, %v864_v7  ;;  %v4083_v25 = vld [vmem:[%s5003_s1 + $0x10] sm:$0xff]   ;;  %v874_v28 = vshrl.u32 %v4330_v6, 16  ;;  %v146_v37 = vshrl.u32 %v4338_v15, 16  ;;  %v882_v43 = vshrl.u32 %v4351_v26, 16  ;;  %v4092_v61 = vld [vmem:[%s5003_s1 + $0x40] sm:$0xff]  }
  0x14   :  { %3665 = vmatprep.subr.bf16.mxu0 %v4077_v52  ;;  %3736 = vmatpush3.bf16.msra.mxu1 %v4073_v33  ;;  %v137_v30 = vsel %vm93_vm1, %v132_v16, %v136_v21  ;;  %v140_v31 = vor.u32 %v138_v18, %v136_v21  ;;  %v144_v32 = vrot.slane %v142_v23, 1  ;;  %v878_v33 = vshll.u32 %v4351_v26, 16  ;;  %v4093_v5 = vld [vmem:[%s5003_s1 + $0x40] sm:$0xff]  }
  0x15   :  { %3651 = vmatprep.mubr.msk.bf16.mxu0 %vm186_vm0, %v121_v60  ;;  %3737 = vmatprep.subr.bf16.mxu1 %v4079_v59  ;;  %v873_v34 = vsel %vm93_vm1, %v868_v22, %v872_v27  ;;  %v876_v35 = vor.u32 %v874_v28, %v872_v27  ;;  %v150_v46 = vshll.u32 %v4367_v40, 16  ;;  %v154_v49 = vshrl.u32 %v4367_v40, 16 }
  0x16   :  { %3723 = vmatprep.mubr.msk.bf16.mxu1 %vm186_vm0, %v857_v2  ;;  %v880_v38 = vrot.slane %v878_v33, 1  ;;  %v145_v41 = vsel %vm93_vm1, %v140_v31, %v144_v32  ;;  %v148_v44 = vor.u32 %v146_v37, %v144_v32  ;;  %v886_v53 = vshll.u32 %v4373_v42, 16  ;;  %v4095_v33 = vld [vmem:[%s5003_s1 + $0x48] sm:$0xff]  }
  0x17   :  { %3666 = vmatpush3.bf16.msra.mxu0 %v4077_v52  ;;  %v890_v54 = vshrl.u32 %v4373_v42, 16  ;;  %v152_v55 = vrot.slane %v150_v46, 1  ;;  %v158_v56 = vshll.u32 %v4380_v48, 16  ;;  %v894_v2 = vshll.u32 %v4394_v58, 16 }
  0x18   :  { %3738 = vmatpush3.bf16.msra.mxu1 %v4079_v59  ;;  %3667 = vmatprep.subr.bf16.mxu0 %v4083_v25  ;;  %v881_v51 = vsel %vm93_vm1, %v876_v35, %v880_v38  ;;  %v884_v52 = vor.u32 %v882_v43, %v880_v38  ;;  %v4091_v59 = vld [vmem:[%s5003_s1 + $0x18] sm:$0xff]   ;;  %v888_v60 = vrot.slane %v886_v53, 1  ;;  %v461_v16 = vrot.slane %v4258_v24, 1 }
  0x19   :  { %3739 = vmatprep.subr.bf16.mxu1 %v4085_v36  ;;  %v153_v62 = vsel %vm93_vm1, %v148_v44, %v152_v55  ;;  %v156_v63 = vor.u32 %v154_v49, %v152_v55  ;;  %v160_v0 = vrot.slane %v158_v56, 1  ;;  %v896_v7 = vrot.slane %v894_v2, 1  ;;  %v4096_v44 = vld [vmem:[%s5003_s1 + $0x50] sm:$0xff]   ;;  %v4098_v53 = vld [vmem:[%s5003_s1 + $0x58] sm:$0xff]   ;;  %v4102_v55 = vld [vmem:[%s5003_s1 + $0x20] sm:$0xff]  }
  0x1a   :  { %3652 = vmatmul.mubr.msk.bf16.gmra.mrb[4].mxu0 %vm186_vm0, %v129_v3  ;;  %v889_v3 = vsel %vm93_vm1, %v884_v52, %v888_v60  ;;  %v892_v4 = vor.u32 %v890_v54, %v888_v60  ;;  %v463_v17 = vrot.slane %v4279_v39, 1  ;;  %v1195_v18 = vrot.slane %v4268_v29, 1  ;;  %v4099_v54 = vld [vmem:[%s5003_s1 + $0x58] sm:$0xff]   ;;  %v4586_v2 = vld [vmem:[%s5002_s0 + $0x8c] sm:$0xff]  }
  0x1b   :  { %3724 = vmatmul.mubr.msk.bf16.gmra.mrb[4].mxu1 %vm186_vm0, %v865_v20  ;;  %3655 = vmatprep.mubr.msk.bf16.mxu0 %vm186_vm0, %v137_v30  ;;  %v161_v8 = vsel %vm93_vm1, %v156_v63, %v160_v0  ;;  %v1197_v20 = vrot.slane %v4288_v45, 1  ;;  %v1199_v23 = vrot.slane %v4309_v57, 1  ;;  %v1201_v30 = vrot.slane %v4330_v6, 1  ;;  %v4109_v0 = vld [vmem:[%s5003_s1 + $0x38] sm:$0xff]  }
  0x1c   :  { %3668 = vmatpush3.bf16.msra.mxu0 %v4083_v25  ;;  %3727 = vmatprep.mubr.msk.bf16.mxu1 %vm186_vm0, %v873_v34  ;;  %v897_v13 = vsel %vm93_vm1, %v892_v4, %v896_v7  ;;  %v4424_v21 = vsel %vm457_vm2, %v461_v16, %v463_v17  ;;  %v4094_v25 = vld [vmem:[%s5003_s1 + $0x48] sm:$0xff]   ;;  %v469_v31 = vrot.slane %v4338_v15, 1  ;;  %v1203_v32 = vrot.slane %v4351_v26, 1  ;;  %v3131_v7 = vld [vmem:[%s5002_s0 + $0x84] sm:$0xe] }
  0x1d   :  { %3740 = vmatpush3.bf16.msra.mxu1 %v4085_v36  ;;  %3669 = vmatprep.subr.bf16.mxu0 %v4089_v50  ;;  %v4431_v22 = vsel %vm457_vm2, %v1195_v18, %v1197_v20  ;;  %v4442_v28 = vsel %vm457_vm2, %v1197_v20, %v1199_v23  ;;  %v4457_v35 = vsel %vm457_vm2, %v1199_v23, %v1201_v30  ;;  %v471_v36 = vrot.slane %v4367_v40, 1  ;;  %v4595_v4 = vld [vmem:[%s5002_s0 + $0xcc] sm:$0xff]  }
  0x1e   :  { %3741 = vmatprep.subr.bf16.mxu1 %v4091_v59  ;;  %v4466_v38 = vsel %vm457_vm2, %v1201_v30, %v1203_v32  ;;  %v473_v43 = vrot.slane %v4380_v48, 1  ;;  %v1207_v49 = vrot.slane %v4394_v58, 1  ;;  %v1193_v60 = vrot.slane %v4236_v12, 1 }
  0x1f   :  { %v4476_v46 = vsel %vm457_vm2, %v469_v31, %v471_v36  ;;  %v2651_v20 = vrot.slane %v4595_v4, 1 }
  0x20   :  { %3670 = vmatpush3.bf16.msra.mxu0 %v4089_v50  ;;  %v4485_v48 = vsel %vm457_vm2, %v471_v36, %v473_v43 }
  0x21   :  { %3742 = vmatpush3.bf16.msra.mxu1 %v4091_v59  ;;  %3687 = vmatprep.subr.bf16.mxu0 %v4092_v61  ;;  %v459_v59 = vrot.slane %v4231_v11, 1 }
  0x22   :  { %3656 = vmatmul.mubr.msk.bf16.gmra.mrb[8].mxu0 %vm186_vm0, %v145_v41  ;;  %3759 = vmatprep.subr.bf16.mxu1 %v4093_v5  ;;  %v1205_v41 = vrot.slane %v4373_v42, 1 }
  0x23   :  { %3728 = vmatmul.mubr.msk.bf16.gmra.mrb[8].mxu1 %vm186_vm0, %v881_v51  ;;  %3659 = vmatprep.mubr.msk.bf16.mxu0 %vm186_vm0, %v153_v62  ;;  %v4097_v51 = vld [vmem:[%s5003_s1 + $0x50] sm:$0xff]   ;;  %v4108_v62 = vld [vmem:[%s5003_s1 + $0x38] sm:$0xff]  }
  0x24   :  { %3731 = vmatprep.mubr.msk.bf16.mxu1 %vm186_vm0, %v889_v3  ;;  %v4482_v50 = vsel %vm457_vm2, %v1203_v32, %v1205_v41  ;;  %v4491_v52 = vsel %vm457_vm2, %v1205_v41, %v1207_v49 }
  0x2a   :  { %3660 = vmatmul.mubr.msk.bf16.gmra.mrb[12].mxu0 %vm186_vm0, %v161_v8  ;;  %v3211_v8 = vld [vmem:[%s5002_s0 + $0xc4] sm:$0xe] }
  0x2b   :  { %3671 = vmatprep.mubr.msk.bf16.mxu0 %vm186_vm0, %v4226_v10  ;;  %3732 = vmatmul.mubr.msk.bf16.gmra.mrb[12].mxu1 %vm186_vm0, %v897_v13  ;;  %v465_v10 = vrot.slane %v4294_v47, 1  ;;  %v4611_v13 = vld [vmem:[%s5003_s1] sm:$0xff]  }
  0x2c   :  { %3743 = vmatprep.mubr.msk.bf16.mxu1 %vm186_vm0, %v4251_v19  ;;  %v467_v19 = vrot.slane %v4322_v1, 1 }
  0x2d   :  { %v4439_v27 = vsel %vm457_vm2, %v463_v17, %v465_v10  ;;  %v1922_v17 = vrot.slane %v4586_v2, 1 }
  0x2e   :  { %v4454_v34 = vsel %vm457_vm2, %v465_v10, %v467_v19  ;;  %v4463_v37 = vsel %vm457_vm2, %v467_v19, %v469_v31 }
  0x32   :  { %3672 = vmatmul.mubr.msk.bf16.vlgmr.msra.gmra.mrb[0].mxu0 %vm186_vm0, %v4231_v11  ;;  %v462_v11 = vsel %vm457_vm2, %v459_v59, %v461_v16 }
  0x33   :  { %3688 = vmatpush3.bf16.msra.mxu0 %v4092_v61  ;;  %3675 = vmatprep.mubr.msk.bf16.mxu0 %vm186_vm0, %v4258_v24  ;;  %v4106_v24 = vld [vmem:[%s5003_s1 + $0x30] sm:$0xff]   ;;  %v3162_v61 = vld [vmem:[%s5002_s0 + $0xc8] sm:$0xf] }
  0x34   :  { %3744 = vmatmul.mubr.msk.bf16.vlgmr.msra.gmra.mrb[0].mxu1 %vm186_vm0, %v4236_v12  ;;  %3689 = vmatprep.subr.bf16.mxu0 %v4094_v25  ;;  %v4104_v12 = vld [vmem:[%s5003_s1 + $0x28] sm:$0xff]  }
  0x35   :  { %3760 = vmatpush3.bf16.msra.mxu1 %v4093_v5  ;;  %3747 = vmatprep.mubr.msk.bf16.mxu1 %vm186_vm0, %v4268_v29  ;;  %v3081_v29 = vld [vmem:[%s5002_s0 + $0x84] sm:$0xf] }
  0x36   :  { %3761 = vmatprep.subr.bf16.mxu1 %v4095_v33 }
  0x37   :  { %3690 = vmatpush3.bf16.msra.mxu0 %v4094_v25 }
  0x38   :  { %3691 = vmatprep.subr.bf16.mxu0 %v4096_v44 }
  0x39   :  { %3762 = vmatpush3.bf16.msra.mxu1 %v4095_v33 }
  0x3a   :  { %3676 = vmatmul.mubr.msk.bf16.gmra.mrb[4].mxu0 %vm186_vm0, %v4279_v39  ;;  %3763 = vmatprep.subr.bf16.mxu1 %v4097_v51  ;;  %v445_v39 = vld [vmem:[%s5002_s0] sm:$0xe] }
  0x3b   :  { %3679 = vmatprep.mubr.msk.bf16.mxu0 %vm186_vm0, %v4294_v47  ;;  %3692 = vmatpush3.bf16.msra.mxu0 %v4096_v44  ;;  %v4103_v47 = vld [vmem:[%s5003_s1 + $0x20] sm:$0xff]   ;;  %v2989_v56 = vcombine.low %v445_v39, %v4223_v9 }
  0x3c   :  { %3748 = vmatmul.mubr.msk.bf16.gmra.mrb[4].mxu1 %vm186_vm0, %v4288_v45  ;;  %3693 = vmatprep.subr.bf16.mxu0 %v4098_v53  ;;  %v1180_v45 = vld [vmem:[%s5002_s0 + $0x40] sm:$0xe] }
  0x3d   :  { %3751 = vmatprep.mubr.msk.bf16.mxu1 %vm186_vm0, %v4309_v57  ;;  %3764 = vmatpush3.bf16.msra.mxu1 %v4097_v51  ;;  %v3052_v57 = vcombine.low %v1180_v45, %v4244_v14  ;;  %v458_v58 = vrot.slane %v2989_v56, 1 }
  0x3e   :  { %3765 = vmatprep.subr.bf16.mxu1 %v4099_v54 }
  0x3f   :  { %3694 = vmatpush3.bf16.msra.mxu0 %v4098_v53  ;;  %v1192_v9 = vrot.slane %v3052_v57, 1 }
  0x40   :  { %3783 = vmatprep.subr.bf16.mxu0 %v4102_v55 }
  0x41   :  { %3766 = vmatpush3.bf16.msra.mxu1 %v4099_v54  ;;  %v1194_v14 = vsel %vm457_vm2, %v1192_v9, %v1193_v60 }
  0x42   :  { %3680 = vmatmul.mubr.msk.bf16.gmra.mrb[8].mxu0 %vm186_vm0, %v4322_v1  ;;  %3855 = vmatprep.subr.bf16.mxu1 %v4103_v47  ;;  %v460_v1 = vsel %vm457_vm2, %v458_v58, %v459_v59 }
  0x43   :  { %3683 = vmatprep.mubr.msk.bf16.mxu0 %vm186_vm0, %v4338_v15  ;;  %v4105_v15 = vld [vmem:[%s5003_s1 + $0x28] sm:$0xff]  }
  0x44   :  { %3752 = vmatmul.mubr.msk.bf16.gmra.mrb[8].mxu1 %vm186_vm0, %v4330_v6  ;;  %v1196_v6 = vsel %vm457_vm2, %v1193_v60, %v1195_v18  ;;  %v3212_v18 = vcombine.low %v3211_v8, %v3162_v61 }
  0x45   :  { %3755 = vmatprep.mubr.msk.bf16.mxu1 %vm186_vm0, %v4351_v26  ;;  %v4107_v26 = vld [vmem:[%s5003_s1 + $0x30] sm:$0xff]  }
  0x4a   :  { %3684 = vmatmul.mubr.msk.bf16.gmra.mrb[12].mxu0 %vm186_vm0, %v4367_v40  ;;  %v3082_v40 = vld [vmem:[%s5002_s0 + $0x88] sm:$0xf] }
  0x4b   :  { %3695 = vmatprep.mubr.msk.bf16.mxu0 %vm186_vm0, %v460_v1  ;;  %v4578_v63 = vcombine.low %v3081_v29, %v3082_v40  ;;  %v3132_v16 = vcombine.low %v3131_v7, %v3082_v40 }
  0x4c   :  { %3756 = vmatmul.mubr.msk.bf16.gmra.mrb[12].mxu1 %vm186_vm0, %v4373_v42  ;;  %v3161_v42 = vld [vmem:[%s5002_s0 + $0xc4] sm:$0xf] }
  0x4d   :  { %3767 = vmatprep.mubr.msk.bf16.mxu1 %vm186_vm0, %v1194_v14  ;;  %v4588_v3 = vcombine.low %v3161_v42, %v3162_v61  ;;  %v1562_v5 = vshll.u32 %v4578_v63, 16 }
  0x52   :  { %3696 = vmatmul.mubr.msk.bf16.vlgmr.msra.gmra.mrb[0].mxu0 %vm186_vm0, %v462_v11 }
  0x53   :  { %3784 = vmatpush3.bf16.msra.mxu0 %v4102_v55  ;;  %3699 = vmatprep.mubr.msk.bf16.mxu0 %vm186_vm0, %v4424_v21 }
  0x54   :  { %3768 = vmatmul.mubr.msk.bf16.vlgmr.msra.gmra.mrb[0].mxu1 %vm186_vm0, %v1196_v6  ;;  %3785 = vmatprep.subr.bf16.mxu0 %v4104_v12 }
  0x55   :  { %3856 = vmatpush3.bf16.msra.mxu1 %v4103_v47  ;;  %3771 = vmatprep.mubr.msk.bf16.mxu1 %vm186_vm0, %v4431_v22 }
  0x56   :  { %3857 = vmatprep.subr.bf16.mxu1 %v4105_v15 }
  0x57   :  { %3786 = vmatpush3.bf16.msra.mxu0 %v4104_v12 }
  0x58   :  { %3787 = vmatprep.subr.bf16.mxu0 %v4106_v24 }
  0x59   :  { %3858 = vmatpush3.bf16.msra.mxu1 %v4105_v15 }
  0x5a   :  { %3700 = vmatmul.mubr.msk.bf16.gmra.mrb[4].mxu0 %vm186_vm0, %v4439_v27  ;;  %3859 = vmatprep.subr.bf16.mxu1 %v4107_v26 }
  0x5b   :  { %3703 = vmatprep.mubr.msk.bf16.mxu0 %vm186_vm0, %v4454_v34  ;;  %3788 = vmatpush3.bf16.msra.mxu0 %v4106_v24 }
  0x5c   :  { %3772 = vmatmul.mubr.msk.bf16.gmra.mrb[4].mxu1 %vm186_vm0, %v4442_v28  ;;  %3789 = vmatprep.subr.bf16.mxu0 %v4108_v62 }
  0x5d   :  { %8 = vsyncpa [#allocation3], 0  ;;  %3775 = vmatprep.mubr.msk.bf16.mxu1 %vm186_vm0, %v4457_v35  ;;  %3860 = vmatpush3.bf16.msra.mxu1 %v4107_v26  ;;  %v2291_v21 = vshll.u32 %v4588_v3, 16  ;;  %v4621_v22 = vld [vmem:[%s5003_s1] sm:$0xff]   ;;  %v1921_v27 = vrot.slane %v3132_v16, 1  ;;  %v2650_v28 = vrot.slane %v3212_v18, 1 }
  0x5e   :  { %v4626_v10 = vld [vmem:[%s5002_s0 + $0xbc] sm:$0xff]   ;;  %3861 = vmatprep.subr.bf16.mxu1 %v4109_v0  ;;  %v4636_v25 = vld [vmem:[%s5002_s0 + $0xc4] ss:$0 sps:$4 sm:$0x11]   ;;  %v1560_v19 = vshrl.u32 %v4578_v63, 16  ;;  %v1567_v30 = vshll.u32 %v4586_v2, 16 }
  0x5f   :  { %v4631_v23 = vld [vmem:[%s5002_s0 + $0xfc] sm:$0xff]   ;;  %3790 = vmatpush3.bf16.msra.mxu0 %v4108_v62  ;;  %v4643_v31 = vld [vmem:[%s5002_s0 + $0x104] ss:$0 sps:$4 sm:$0x11]   ;;  %v1934_v32 = vrot.slane %v4626_v10, 1  ;;  %v1564_v33 = vrot.slane %v1562_v5, 1  ;;  %v4650_v34 = vsel %vm457_vm2, %v1921_v27, %v1922_v17  ;;  %v4655_v35 = vsel %vm457_vm2, %v2650_v28, %v2651_v20 }
  0x60   :  { %3807 = vmatprep.subr.bf16.mxu0 %v4611_v13  ;;  %v2663_v36 = vrot.slane %v4631_v23, 1  ;;  %v1936_v41 = vrot.slane %v4636_v25, 1  ;;  %v2665_v43 = vrot.slane %v4643_v31, 1  ;;  %v2289_v44 = vshrl.u32 %v4588_v3, 16  ;;  %v4667_v53 = vld [vmem:[%s5002_s0 + $0x94] sm:$0xff]   ;;  %v4716_v15 = vld [vmem:[%s5002_s0 + $0xa4] sm:$0xff]  }
  0x61   :  { %3862 = vmatpush3.bf16.msra.mxu1 %v4109_v0  ;;  %v2293_v49 = vrot.slane %v2291_v21, 1  ;;  %v2296_v51 = vshll.u32 %v4595_v4, 16  ;;  %v1565_v55 = vor.u32 %v1564_v33, %v1560_v19  ;;  %v1569_v39 = vrot.slane %v1567_v30, 1  ;;  %v4687_v47 = vld [vmem:[%s5002_s0 + $0xd4] sm:$0xff]   ;;  %v4724_v40 = vld [vmem:[%s5002_s0 + $0xe4] sm:$0xff]   ;;  %v4729_v42 = vld [vmem:[%s5002_s0 + $0xac] sm:$0xff]  }
  0x62   :  { %3704 = vmatmul.mubr.msk.bf16.gmra.mrb[8].mxu0 %vm186_vm0, %v4463_v37  ;;  %3879 = vmatprep.subr.bf16.mxu1 %v4621_v22  ;;  %v4675_v54 = vsel %vm457_vm2, %v1934_v32, %v1936_v41  ;;  %v4680_v37 = vsel %vm457_vm2, %v2663_v36, %v2665_v43  ;;  %v1575_v57 = vshll.u32 %v4667_v53, 16  ;;  %v1571_v58 = vshrl.u32 %v4586_v2, 16  ;;  %v4736_v5 = vld [vmem:[%s5002_s0 + $0xec] sm:$0xff]  }
  0x63   :  { %3707 = vmatprep.mubr.msk.bf16.mxu0 %vm186_vm0, %v4476_v46  ;;  %v4692_v46 = vld [vmem:[%s5002_s0 + $0x9c] sm:$0xff]   ;;  %v2294_v45 = vor.u32 %v2293_v49, %v2289_v44  ;;  %v2298_v56 = vrot.slane %v2296_v51, 1  ;;  %v1570_v59 = vsel %vm93_vm1, %v1565_v55, %v1569_v39  ;;  %v2304_v9 = vshll.u32 %v4687_v47, 16  ;;  %v4121_v18 = vld [vmem:[%s5003_s1 + $0x8] sm:$0xff]   ;;  %v4759_v51 = vld [vmem:[%s5002_s0 + $0xb4] sm:$0xff]  }
  0x64   :  { %3776 = vmatmul.mubr.msk.bf16.gmra.mrb[8].mxu1 %vm186_vm0, %v4466_v38  ;;  %v4700_v38 = vld [vmem:[%s5002_s0 + $0xdc] sm:$0xff]   ;;  %v1579_v60 = vshrl.u32 %v4667_v53, 16  ;;  %v1583_v1 = vshll.u32 %v4692_v46, 16  ;;  %v1577_v11 = vrot.slane %v1575_v57, 1  ;;  %v2308_v12 = vshrl.u32 %v4687_v47, 16  ;;  %v4123_v43 = vld [vmem:[%s5003_s1 + $0x8] sm:$0xff]  }
  0x65   :  { %3779 = vmatprep.mubr.msk.bf16.mxu1 %vm186_vm0, %v4482_v50  ;;  %v2300_v50 = vshrl.u32 %v4595_v4, 16  ;;  %v2299_v14 = vsel %vm93_vm1, %v2294_v45, %v2298_v56  ;;  %v2312_v6 = vshll.u32 %v4700_v38, 16  ;;  %v1573_v24 = vor.u32 %v1571_v58, %v1569_v39  ;;  %v4127_v57 = vld [vmem:[%s5003_s1 + $0x10] sm:$0xff]  }
  0x66   :  { %v2306_v29 = vrot.slane %v2304_v9, 1  ;;  %v1585_v26 = vrot.slane %v1583_v1, 1  ;;  %v1587_v8 = vshrl.u32 %v4692_v46, 16  ;;  %v2320_v21 = vshll.u32 %v4724_v40, 16  ;;  %v4770_v58 = vld [vmem:[%s5002_s0 + $0xf4] sm:$0xff]  }
  0x67   :  { %v2302_v61 = vor.u32 %v2300_v50, %v2298_v56  ;;  %v2314_v0 = vrot.slane %v2312_v6, 1  ;;  %v1578_v7 = vsel %vm93_vm1, %v1573_v24, %v1577_v11  ;;  %v1595_v27 = vshrl.u32 %v4716_v15, 16  ;;  %v4129_v1 = vld [vmem:[%s5003_s1 + $0x10] sm:$0xff]   ;;  %v4133_v24 = vld [vmem:[%s5003_s1 + $0x18] sm:$0xff]  }
  0x68   :  { %v2310_v62 = vor.u32 %v2308_v12, %v2306_v29  ;;  %v1599_v28 = vshll.u32 %v4729_v42, 16  ;;  %v2316_v30 = vshrl.u32 %v4700_v38, 16  ;;  %v2324_v44 = vshrl.u32 %v4724_v40, 16 }
  0x69   :  { %v2307_v19 = vsel %vm93_vm1, %v2302_v61, %v2306_v29  ;;  %v2328_v49 = vshll.u32 %v4736_v5, 16  ;;  %v1589_v55 = vor.u32 %v1587_v8, %v1585_v26  ;;  %v2322_v39 = vrot.slane %v2320_v21, 1  ;;  %v4136_v21 = vld [vmem:[%s5003_s1 + $0x40] sm:$0xff]  }
  0x6a   :  { %3708 = vmatmul.mubr.msk.bf16.gmra.mrb[12].mxu0 %vm186_vm0, %v4485_v48  ;;  %v1581_v48 = vor.u32 %v1579_v60, %v1577_v11  ;;  %v2315_v33 = vsel %vm93_vm1, %v2310_v62, %v2314_v0  ;;  %v1601_v56 = vrot.slane %v1599_v28, 1  ;;  %v1607_v60 = vshll.u32 %v4759_v51, 16 }
  0x6b   :  { %3791 = vmatprep.mubr.msk.bf16.mxu0 %vm186_vm0, %v1570_v59  ;;  %v2326_v59 = vor.u32 %v2324_v44, %v2322_v39  ;;  %v2330_v9 = vrot.slane %v2328_v49, 1  ;;  %v1611_v12 = vshrl.u32 %v4759_v51, 16  ;;  %v1615_v6 = vshll.u32 %v4626_v10, 16 }
  0x6c   :  { %3780 = vmatmul.mubr.msk.bf16.gmra.mrb[12].mxu1 %vm186_vm0, %v4491_v52  ;;  %v1591_v52 = vshll.u32 %v4716_v15, 16  ;;  %v1586_v16 = vsel %vm93_vm1, %v1581_v48, %v1585_v26  ;;  %v2332_v48 = vshrl.u32 %v4736_v5, 16  ;;  %v1609_v61 = vrot.slane %v1607_v60, 1  ;;  %v4139_v60 = vld [vmem:[%s5003_s1 + $0x48] sm:$0xff]  }
  0x6d   :  { %3863 = vmatprep.mubr.msk.bf16.mxu1 %vm186_vm0, %v2299_v14  ;;  %v1603_v14 = vshrl.u32 %v4729_v42, 16  ;;  %v2331_v26 = vsel %vm93_vm1, %v2326_v59, %v2330_v9  ;;  %v2340_v62 = vshrl.u32 %v4770_v58, 16 }
  0x6e   :  { %v1593_v41 = vrot.slane %v1591_v52, 1  ;;  %v4135_v52 = vld [vmem:[%s5003_s1 + $0x18] sm:$0xff]  }
  0x70   :  { %v1597_v45 = vor.u32 %v1595_v27, %v1593_v41  ;;  %v1594_v50 = vsel %vm93_vm1, %v1589_v55, %v1593_v41  ;;  %v2334_v27 = vor.u32 %v2332_v48, %v2330_v9  ;;  %v1619_v41 = vshrl.u32 %v4626_v10, 16  ;;  %v4138_v9 = vld [vmem:[%s5003_s1 + $0x48] sm:$0xff]  }
  0x71   :  { %v2348_v55 = vshrl.u32 %v4631_v23, 16 }
  0x72   :  { %3792 = vmatmul.mubr.msk.bf16.vlgmr.msra.gmra.mrb[16].mxu0 %vm186_vm0, %v1578_v7  ;;  %v1602_v11 = vsel %vm93_vm1, %v1597_v45, %v1601_v56  ;;  %v1605_v7 = vor.u32 %v1603_v14, %v1601_v56  ;;  %v1924_v14 = vrot.slane %v4667_v53, 1 }
  0x73   :  { %3808 = vmatpush3.bf16.msra.mxu0 %v4611_v13  ;;  %3795 = vmatprep.mubr.msk.bf16.mxu0 %vm186_vm0, %v1586_v16  ;;  %v2318_v13 = vor.u32 %v2316_v30, %v2314_v0  ;;  %v2344_v0 = vshll.u32 %v4631_v23, 16  ;;  %v1613_v16 = vor.u32 %v1611_v12, %v1609_v61  ;;  %v4137_v30 = vld [vmem:[%s5003_s1 + $0x40] sm:$0xff]   ;;  %v2655_v12 = vrot.slane %v4700_v38, 1 }
  0x74   :  { %3864 = vmatmul.mubr.msk.bf16.vlgmr.msra.gmra.mrb[16].mxu1 %vm186_vm0, %v2307_v19  ;;  %3809 = vmatprep.subr.bf16.mxu0 %v4121_v18 }
  0x75   :  { %3880 = vmatpush3.bf16.msra.mxu1 %v4621_v22  ;;  %3867 = vmatprep.mubr.msk.bf16.mxu1 %vm186_vm0, %v2315_v33  ;;  %v2336_v22 = vshll.u32 %v4770_v58, 16  ;;  %v2323_v29 = vsel %vm93_vm1, %v2318_v13, %v2322_v39  ;;  %v2346_v19 = vrot.slane %v2344_v0, 1  ;;  %v1610_v33 = vsel %vm93_vm1, %v1605_v7, %v1609_v61 }
  0x76   :  { %3881 = vmatprep.subr.bf16.mxu1 %v4123_v43  ;;  %v2352_v39 = vshll.u32 %v4643_v31, 16 }
  0x77   :  { %3810 = vmatpush3.bf16.msra.mxu0 %v4121_v18  ;;  %v2338_v8 = vrot.slane %v2336_v22, 1  ;;  %v1617_v18 = vrot.slane %v1615_v6, 1  ;;  %v2653_v22 = vrot.slane %v4687_v47, 1  ;;  %v1925_v6 = vsel %vm457_vm2, %v1922_v17, %v1924_v14 }
  0x78   :  { %3811 = vmatprep.subr.bf16.mxu0 %v4127_v57  ;;  %v2354_v13 = vrot.slane %v2352_v39, 1  ;;  %v2657_v17 = vrot.slane %v4724_v40, 1 }
  0x79   :  { %3882 = vmatpush3.bf16.msra.mxu1 %v4123_v43  ;;  %v2342_v28 = vor.u32 %v2340_v62, %v2338_v8  ;;  %v1623_v43 = vshll.u32 %v4636_v25, 16  ;;  %v1618_v44 = vsel %vm93_vm1, %v1613_v16, %v1617_v18  ;;  %v2339_v49 = vsel %vm93_vm1, %v2334_v27, %v2338_v8 }
  0x7a   :  { %3796 = vmatmul.mubr.msk.bf16.gmra.mrb[20].mxu0 %vm186_vm0, %v1594_v50  ;;  %3883 = vmatprep.subr.bf16.mxu1 %v4129_v1  ;;  %v1621_v56 = vor.u32 %v1619_v41, %v1617_v18  ;;  %v4143_v50 = vld [vmem:[%s5003_s1 + $0x58] sm:$0xff]  }
  0x7b   :  { %3799 = vmatprep.mubr.msk.bf16.mxu0 %vm186_vm0, %v1602_v11  ;;  %3812 = vmatpush3.bf16.msra.mxu0 %v4127_v57  ;;  %v2347_v45 = vsel %vm93_vm1, %v2342_v28, %v2346_v19  ;;  %v1625_v25 = vrot.slane %v1623_v43, 1  ;;  %v2350_v57 = vor.u32 %v2348_v55, %v2346_v19  ;;  %v1926_v11 = vrot.slane %v4692_v46, 1 }
  0x7c   :  { %3868 = vmatmul.mubr.msk.bf16.gmra.mrb[20].mxu1 %vm186_vm0, %v2323_v29  ;;  %3813 = vmatprep.subr.bf16.mxu0 %v4133_v24 }
  0x7d   :  { %3871 = vmatprep.mubr.msk.bf16.mxu1 %vm186_vm0, %v2331_v26  ;;  %3884 = vmatpush3.bf16.msra.mxu1 %v4129_v1  ;;  %v1626_v59 = vsel %vm93_vm1, %v1621_v56, %v1625_v25  ;;  %v2355_v31 = vsel %vm93_vm1, %v2350_v57, %v2354_v13  ;;  %v4142_v1 = vld [vmem:[%s5003_s1 + $0x58] sm:$0xff]  }
  0x7e   :  { %3885 = vmatprep.subr.bf16.mxu1 %v4135_v52 }
  0x7f   :  { %3814 = vmatpush3.bf16.msra.mxu0 %v4133_v24 }
  0x80   :  { %3831 = vmatprep.subr.bf16.mxu0 %v4136_v21 }
  0x81   :  { %3886 = vmatpush3.bf16.msra.mxu1 %v4135_v52 }
  0x82   :  { %3800 = vmatmul.mubr.msk.bf16.gmra.mrb[24].mxu0 %vm186_vm0, %v1610_v33  ;;  %3903 = vmatprep.subr.bf16.mxu1 %v4137_v30 }
  0x83   :  { %3803 = vmatprep.mubr.msk.bf16.mxu0 %vm186_vm0, %v1618_v44 }
  0x84   :  { %3872 = vmatmul.mubr.msk.bf16.gmra.mrb[24].mxu1 %vm186_vm0, %v2339_v49 }
  0x85   :  { %3875 = vmatprep.mubr.msk.bf16.mxu1 %vm186_vm0, %v2347_v45 }
  0x8a   :  { %3804 = vmatmul.mubr.msk.bf16.gmra.mrb[28].mxu0 %vm186_vm0, %v1626_v59 }
  0x8b   :  { %3815 = vmatprep.mubr.msk.bf16.mxu0 %vm186_vm0, %v4578_v63  ;;  %v4140_v63 = vld [vmem:[%s5003_s1 + $0x50] sm:$0xff]  }
  0x8c   :  { %3876 = vmatmul.mubr.msk.bf16.gmra.mrb[28].mxu1 %vm186_vm0, %v2355_v31 }
  0x8d   :  { %3887 = vmatprep.mubr.msk.bf16.mxu1 %vm186_vm0, %v4588_v3  ;;  %v4141_v3 = vld [vmem:[%s5003_s1 + $0x50] sm:$0xff]  }
  0x92   :  { %3816 = vmatmul.mubr.msk.bf16.vlgmr.msra.gmra.mrb[16].mxu0 %vm186_vm0, %v4586_v2  ;;  %v1930_v2 = vrot.slane %v4729_v42, 1 }
  0x93   :  { %3832 = vmatpush3.bf16.msra.mxu0 %v4136_v21  ;;  %3819 = vmatprep.mubr.msk.bf16.mxu0 %vm186_vm0, %v4667_v53  ;;  %v2654_v53 = vsel %vm457_vm2, %v2651_v20, %v2653_v22 }
  0x94   :  { %3888 = vmatmul.mubr.msk.bf16.vlgmr.msra.gmra.mrb[16].mxu1 %vm186_vm0, %v4595_v4  ;;  %3833 = vmatprep.subr.bf16.mxu0 %v4138_v9  ;;  %v2659_v4 = vrot.slane %v4736_v5, 1 }
  0x95   :  { %3904 = vmatpush3.bf16.msra.mxu1 %v4137_v30  ;;  %3891 = vmatprep.mubr.msk.bf16.mxu1 %vm186_vm0, %v4687_v47 }
  0x96   :  { %3905 = vmatprep.subr.bf16.mxu1 %v4139_v60 }
  0x97   :  { %3834 = vmatpush3.bf16.msra.mxu0 %v4138_v9 }
  0x98   :  { %3835 = vmatprep.subr.bf16.mxu0 %v4140_v63 }
  0x99   :  { %3906 = vmatpush3.bf16.msra.mxu1 %v4139_v60 }
  0x9a   :  { %3820 = vmatmul.mubr.msk.bf16.gmra.mrb[20].mxu0 %vm186_vm0, %v4692_v46  ;;  %3907 = vmatprep.subr.bf16.mxu1 %v4141_v3  ;;  %v2656_v46 = vsel %vm457_vm2, %v2653_v22, %v2655_v12 }
  0x9b   :  { %3823 = vmatprep.mubr.msk.bf16.mxu0 %vm186_vm0, %v4716_v15  ;;  %3836 = vmatpush3.bf16.msra.mxu0 %v4140_v63 }
  0x9c   :  { %3892 = vmatmul.mubr.msk.bf16.gmra.mrb[20].mxu1 %vm186_vm0, %v4700_v38  ;;  %3837 = vmatprep.subr.bf16.mxu0 %v4142_v1  ;;  %v2658_v38 = vsel %vm457_vm2, %v2655_v12, %v2657_v17 }
  0x9d   :  { %3895 = vmatprep.mubr.msk.bf16.mxu1 %vm186_vm0, %v4724_v40  ;;  %3908 = vmatpush3.bf16.msra.mxu1 %v4141_v3  ;;  %v2661_v40 = vrot.slane %v4770_v58, 1 }
  0x9e   :  { %3909 = vmatprep.subr.bf16.mxu1 %v4143_v50 }
  0x9f   :  { %3838 = vmatpush3.bf16.msra.mxu0 %v4142_v1  ;;  %v2662_v29 = vsel %vm457_vm2, %v2659_v4, %v2661_v40 }
  0xa1   :  { %3910 = vmatpush3.bf16.msra.mxu1 %v4143_v50 }
  0xa2   :  { %3824 = vmatmul.mubr.msk.bf16.gmra.mrb[24].mxu0 %vm186_vm0, %v4729_v42  ;;  %v1932_v42 = vrot.slane %v4759_v51, 1 }
  0xa3   :  { %3827 = vmatprep.mubr.msk.bf16.mxu0 %vm186_vm0, %v4759_v51  ;;  %v2664_v51 = vsel %vm457_vm2, %v2661_v40, %v2663_v36 }
  0xa4   :  { %3896 = vmatmul.mubr.msk.bf16.gmra.mrb[24].mxu1 %vm186_vm0, %v4736_v5  ;;  %v1933_v5 = vsel %vm457_vm2, %v1930_v2, %v1932_v42  ;;  %v1935_v24 = vsel %vm457_vm2, %v1932_v42, %v1934_v32 }
  0xa5   :  { %3899 = vmatprep.mubr.msk.bf16.mxu1 %vm186_vm0, %v4770_v58 }
  0xaa   :  { %3828 = vmatmul.mubr.msk.bf16.gmra.mrb[28].mxu0 %vm186_vm0, %v4626_v10  ;;  %v4924_v10 = vld [vmem:[%s5004_s2] ss:$0 sm:$0xff]  ;;  %s4170_s2 = smov [#allocation2]  }
  0xab   :  { %3839 = vmatprep.mubr.msk.bf16.mxu0 %vm186_vm0, %v4650_v34  ;;  %v1927_v34 = vsel %vm457_vm2, %v1924_v14, %v1926_v11  ;;  %s2945_s7 = sshll.u32 %s4170_s2, 4  ;;  %s2946_s7 = int_to_ptr.vmem [resolvable:$true] %s2945_s7 }
  0xac   :  { %3900 = vmatmul.mubr.msk.bf16.gmra.mrb[28].mxu1 %vm186_vm0, %v4631_v23  ;;  %s4146_s8 = scalar_lea.vmem %s2946_s7, 4096  ;;  %p4151_p1 = scmp.lt.s32.totalorder %s2946_s7, %s2946_s7 }
  0xad   :  { %3911 = vmatprep.mubr.msk.bf16.mxu1 %vm186_vm0, %v4655_v35  ;;  %v1928_v35 = vrot.slane %v4716_v15, 1  ;;  %v2660_v15 = vsel %vm457_vm2, %v2657_v17, %v2659_v4  ;;  %p4147_p0 = scmp.ne.s32.totalorder %s2946_s7, %s4146_s8  ;;  %p4152_p2 = scmp.lt.s32.totalorder %s4146_s8, %s4146_s8 }
  0xaf   :  { %v1929_v20 = vsel %vm457_vm2, %v1926_v11, %v1928_v35  ;;  %v1931_v47 = vsel %vm457_vm2, %v1928_v35, %v1930_v2  ;;  %p4153_p3 = por %p4152_p2, %p4151_p1 }
  0xb1   :  { %p4154_p4 = pnand %p4153_p3, %p4147_p0 }
  0xb2   :  { %3840 = vmatmul.mubr.msk.bf16.vlgmr.msra.gmra.mrb[16].mxu0 %vm186_vm0, %v1925_v6 }
  0xb3   :  { %3843 = vmatprep.mubr.msk.bf16.mxu0 %vm186_vm0, %v1927_v34 }
  0xb4   :  { %3912 = vmatmul.mubr.msk.bf16.vlgmr.msra.gmra.mrb[16].mxu1 %vm186_vm0, %v2654_v53 }
  0xb5   :  { %3915 = vmatprep.mubr.msk.bf16.mxu1 %vm186_vm0, %v2656_v46 }
  0xba   :  { %3844 = vmatmul.mubr.msk.bf16.gmra.mrb[20].mxu0 %vm186_vm0, %v1929_v20 }
  0xbb   :  { %3847 = vmatprep.mubr.msk.bf16.mxu0 %vm186_vm0, %v1931_v47 }
  0xbc   :  { %3916 = vmatmul.mubr.msk.bf16.gmra.mrb[20].mxu1 %vm186_vm0, %v2658_v38 }
  0xbd   :  { %3919 = vmatprep.mubr.msk.bf16.mxu1 %vm186_vm0, %v2660_v15 }
  0xc2   :  { %3848 = vmatmul.mubr.msk.bf16.gmra.mrb[24].mxu0 %vm186_vm0, %v1933_v5 }
  0xc3   :  { %3851 = vmatprep.mubr.msk.bf16.mxu0 %vm186_vm0, %v1935_v24 }
  0xc4   :  { %3920 = vmatmul.mubr.msk.bf16.gmra.mrb[24].mxu1 %vm186_vm0, %v2662_v29 }
  0xc5   :  { %3923 = vmatprep.mubr.msk.bf16.mxu1 %vm186_vm0, %v2664_v51 }
  0xca   :  { %3852 = vmatmul.mubr.msk.bf16.gmra.mrb[28].mxu0 %vm186_vm0, %v4675_v54 }
  0xcc   :  { %3924 = vmatmul.mubr.msk.bf16.gmra.mrb[28].mxu1 %vm186_vm0, %v4680_v37 }
 0x125   :  { %v3697_v23 = vpop.f32.mrb[0].mxu0 }
 0x126   :  { %v644_v32 = vadd.f32 %v3697_v23, %v4924_v10  ;;  %v557_v36 = vpop.f32.mrb[1].mxu0 }
 0x127   :  { %v3769_v58 = vpop.f32.mrb[0].mxu1  ;;  %v642_v48 = vadd.f32 %v4924_v10, %v557_v36  ;;  %v3698_v26 = vpop.f32.mrb[2].mxu0 }
 0x128   :  { %v1372_v61 = vadd.f32 %v3769_v58, %v4924_v10  ;;  %v1291_v62 = vpop.f32.mrb[1].mxu1  ;;  %v645_v54 = vadd.f32 %v3698_v26, %v4924_v10  ;;  %v560_v0 = vpop.f32.mrb[3].mxu0  ;;  %v660_v8 = vmax.f32 %v644_v32, 0.0 }
 0x129   :  { %v1370_v37 = vadd.f32 %v4924_v10, %v1291_v62  ;;  %v3770_v52 = vpop.f32.mrb[2].mxu1  ;;  %v643_v7 = vadd.f32 %v4924_v10, %v560_v0  ;;  %v658_v27 = vmax.f32 %v642_v48, 0.0 }
 0x12a   :  { %v661_v16 = vmax.f32 %v645_v54, 0.0  ;;  %v1373_v18 = vadd.f32 %v3770_v52, %v4924_v10  ;;  %v1294_v21 = vpop.f32.mrb[3].mxu1  ;;  %v1388_v30 = vmax.f32 %v1372_v61, 0.0 }
 0x12b   :  { %v659_v28 = vmax.f32 %v643_v7, 0.0  ;;  %v1371_v19 = vadd.f32 %v4924_v10, %v1294_v21  ;;  %v1386_v43 = vmax.f32 %v1370_v37, 0.0 }
 0x12c   :  { %v3313_v33 = vpack.c.bf16 %v661_v16, %v660_v8  ;;  %v1389_v41 = vmax.f32 %v1373_v18, 0.0 }
 0x12d   :  { %v3308_v44 = vpack.c.bf16 %v659_v28, %v658_v27  ;;  %v1387_v49 = vmax.f32 %v1371_v19, 0.0  ;;  %v3701_v55 = vpop.f32.mrb[4].mxu0 }
 0x12e   :  { %3465 = vst [vmem:[#allocation2 + $0x8] sm:$0xff] %v3313_v33   ;;  %v3353_v39 = vpack.c.bf16 %v1389_v41, %v1388_v30  ;;  %v648_v45 = vadd.f32 %v3701_v55, %v4924_v10  ;;  %v573_v56 = vpop.f32.mrb[5].mxu0 }
 0x12f   :  { %3309 = vst [vmem:[#allocation2] sm:$0xff] %v3308_v44   ;;  %v3348_v25 = vpack.c.bf16 %v1387_v49, %v1386_v43  ;;  %v3773_v57 = vpop.f32.mrb[4].mxu1  ;;  %v646_v13 = vadd.f32 %v4924_v10, %v573_v56  ;;  %v3702_v59 = vpop.f32.mrb[6].mxu0 }
 0x130   :  { %3473 = vst [vmem:[#allocation2 + $0x48] sm:$0xff] %v3353_v39   ;;  %v1376_v31 = vadd.f32 %v3773_v57, %v4924_v10  ;;  %v1307_v9 = vpop.f32.mrb[5].mxu1  ;;  %v649_v60 = vadd.f32 %v3702_v59, %v4924_v10  ;;  %v576_v63 = vpop.f32.mrb[7].mxu0  ;;  %v664_v14 = vmax.f32 %v648_v45, 0.0 }
 0x131   :  { %3472 = vst [vmem:[#allocation2 + $0x40] sm:$0xff] %v3348_v25   ;;  %v1374_v3 = vadd.f32 %v4924_v10, %v1307_v9  ;;  %v3774_v1 = vpop.f32.mrb[6].mxu1  ;;  %v647_v50 = vadd.f32 %v4924_v10, %v576_v63  ;;  %v662_v6 = vmax.f32 %v646_v13, 0.0 }
 0x132   :  { %v665_v11 = vmax.f32 %v649_v60, 0.0  ;;  %v1377_v22 = vadd.f32 %v3774_v1, %v4924_v10  ;;  %v1310_v12 = vpop.f32.mrb[7].mxu1  ;;  %v1392_v46 = vmax.f32 %v1376_v31, 0.0 }
 0x133   :  { %v663_v34 = vmax.f32 %v647_v50, 0.0  ;;  %v1375_v53 = vadd.f32 %v4924_v10, %v1310_v12  ;;  %v1390_v17 = vmax.f32 %v1374_v3, 0.0 }
 0x134   :  { %v3323_v35 = vpack.c.bf16 %v665_v11, %v664_v14  ;;  %v1393_v2 = vmax.f32 %v1377_v22, 0.0 }
 0x135   :  { %v3318_v4 = vpack.c.bf16 %v663_v34, %v662_v6  ;;  %v1391_v20 = vmax.f32 %v1375_v53, 0.0  ;;  %v3705_v47 = vpop.f32.mrb[8].mxu0 }
 0x136   :  { %3467 = vst [vmem:[#allocation2 + $0x18] sm:$0xff] %v3323_v35   ;;  %v3363_v38 = vpack.c.bf16 %v1393_v2, %v1392_v46  ;;  %v652_v15 = vadd.f32 %v3705_v47, %v4924_v10  ;;  %v589_v42 = vpop.f32.mrb[9].mxu0 }
 0x137   :  { %3466 = vst [vmem:[#allocation2 + $0x10] sm:$0xff] %v3318_v4   ;;  %v3358_v40 = vpack.c.bf16 %v1391_v20, %v1390_v17  ;;  %v3777_v5 = vpop.f32.mrb[8].mxu1  ;;  %v650_v24 = vadd.f32 %v4924_v10, %v589_v42  ;;  %v3706_v29 = vpop.f32.mrb[10].mxu0 }
 0x138   :  { %3475 = vst [vmem:[#allocation2 + $0x58] sm:$0xff] %v3363_v38   ;;  %v1380_v51 = vadd.f32 %v3777_v5, %v4924_v10  ;;  %v1323_v23 = vpop.f32.mrb[9].mxu1  ;;  %v653_v32 = vadd.f32 %v3706_v29, %v4924_v10  ;;  %v592_v36 = vpop.f32.mrb[11].mxu0  ;;  %v668_v61 = vmax.f32 %v652_v15, 0.0 }
 0x139   :  { %3474 = vst [vmem:[#allocation2 + $0x50] sm:$0xff] %v3358_v40   ;;  %v1378_v58 = vadd.f32 %v4924_v10, %v1323_v23  ;;  %v3778_v48 = vpop.f32.mrb[10].mxu1  ;;  %v651_v26 = vadd.f32 %v4924_v10, %v592_v36  ;;  %v666_v37 = vmax.f32 %v650_v24, 0.0 }
 0x13a   :  { %v669_v62 = vmax.f32 %v653_v32, 0.0  ;;  %v1381_v54 = vadd.f32 %v3778_v48, %v4924_v10  ;;  %v1326_v0 = vpop.f32.mrb[11].mxu1  ;;  %v1396_v8 = vmax.f32 %v1380_v51, 0.0 }
 0x13b   :  { %v667_v52 = vmax.f32 %v651_v26, 0.0  ;;  %v1379_v7 = vadd.f32 %v4924_v10, %v1326_v0  ;;  %v1394_v21 = vmax.f32 %v1378_v58, 0.0 }
 0x13c   :  { %v3333_v16 = vpack.c.bf16 %v669_v62, %v668_v61  ;;  %v1397_v18 = vmax.f32 %v1381_v54, 0.0 }
 0x13d   :  { %v3328_v27 = vpack.c.bf16 %v667_v52, %v666_v37  ;;  %v1395_v28 = vmax.f32 %v1379_v7, 0.0  ;;  %v3709_v19 = vpop.f32.mrb[12].mxu0 }
 0x13e   :  { %3469 = vst [vmem:[#allocation2 + $0x28] sm:$0xff] %v3333_v16   ;;  %v3373_v30 = vpack.c.bf16 %v1397_v18, %v1396_v8  ;;  %v656_v33 = vadd.f32 %v3709_v19, %v4924_v10  ;;  %v605_v41 = vpop.f32.mrb[13].mxu0 }
 0x13f   :  { %3468 = vst [vmem:[#allocation2 + $0x20] sm:$0xff] %v3328_v27   ;;  %v3368_v43 = vpack.c.bf16 %v1395_v28, %v1394_v21  ;;  %v3781_v44 = vpop.f32.mrb[12].mxu1  ;;  %v654_v49 = vadd.f32 %v4924_v10, %v605_v41  ;;  %v3710_v55 = vpop.f32.mrb[14].mxu0 }
 0x140   :  { %3477 = vst [vmem:[#allocation2 + $0x68] sm:$0xff] %v3373_v30   ;;  %v1384_v39 = vadd.f32 %v3781_v44, %v4924_v10  ;;  %v1339_v45 = vpop.f32.mrb[13].mxu1  ;;  %v657_v56 = vadd.f32 %v3710_v55, %v4924_v10  ;;  %v608_v25 = vpop.f32.mrb[15].mxu0  ;;  %v672_v31 = vmax.f32 %v656_v33, 0.0 }
 0x141   :  { %3476 = vst [vmem:[#allocation2 + $0x60] sm:$0xff] %v3368_v43   ;;  %v1382_v57 = vadd.f32 %v4924_v10, %v1339_v45  ;;  %v3782_v13 = vpop.f32.mrb[14].mxu1  ;;  %v655_v59 = vadd.f32 %v4924_v10, %v608_v25  ;;  %v670_v3 = vmax.f32 %v654_v49, 0.0 }
 0x142   :  { %v673_v9 = vmax.f32 %v657_v56, 0.0  ;;  %v1385_v60 = vadd.f32 %v3782_v13, %v4924_v10  ;;  %v1342_v63 = vpop.f32.mrb[15].mxu1  ;;  %v1400_v14 = vmax.f32 %v1384_v39, 0.0 }
 0x143   :  { %v671_v1 = vmax.f32 %v655_v59, 0.0  ;;  %v1383_v50 = vadd.f32 %v4924_v10, %v1342_v63  ;;  %v1398_v12 = vmax.f32 %v1382_v57, 0.0 }
 0x144   :  { %v3343_v11 = vpack.c.bf16 %v673_v9, %v672_v31  ;;  %v1401_v22 = vmax.f32 %v1385_v60, 0.0 }
 0x145   :  { %v3338_v6 = vpack.c.bf16 %v671_v1, %v670_v3  ;;  %v1399_v34 = vmax.f32 %v1383_v50, 0.0 }
 0x146   :  { %3471 = vst [vmem:[#allocation2 + $0x38] sm:$0xff] %v3343_v11   ;;  %v3383_v53 = vpack.c.bf16 %v1401_v22, %v1400_v14 }
 0x147   :  { %3470 = vst [vmem:[#allocation2 + $0x30] sm:$0xff] %v3338_v6   ;;  %v3378_v46 = vpack.c.bf16 %v1399_v34, %v1398_v12 }
 0x148   :  { %3479 = vst [vmem:[#allocation2 + $0x78] sm:$0xff] %v3383_v53  }
 0x149   :  { %3478 = vst [vmem:[#allocation2 + $0x70] sm:$0xff] %v3378_v46  }
 0x185   :  { %v3841_v35 = vpop.f32.mrb[16].mxu0 }
 0x186   :  { %v2101_v2 = vadd.f32 %v3841_v35, %v4924_v10  ;;  %v2020_v17 = vpop.f32.mrb[17].mxu0 }
 0x187   :  { %v3913_v4 = vpop.f32.mrb[16].mxu1  ;;  %v2099_v20 = vadd.f32 %v4924_v10, %v2020_v17  ;;  %v3842_v47 = vpop.f32.mrb[18].mxu0 }
 0x188   :  { %v2830_v38 = vadd.f32 %v3913_v4, %v4924_v10  ;;  %v2749_v15 = vpop.f32.mrb[17].mxu1  ;;  %v2102_v42 = vadd.f32 %v3842_v47, %v4924_v10  ;;  %v2023_v40 = vpop.f32.mrb[19].mxu0  ;;  %v2117_v51 = vmax.f32 %v2101_v2, 0.0 }
 0x189   :  { %v2828_v5 = vadd.f32 %v4924_v10, %v2749_v15  ;;  %v3914_v24 = vpop.f32.mrb[18].mxu1  ;;  %v2100_v29 = vadd.f32 %v4924_v10, %v2023_v40  ;;  %v2115_v58 = vmax.f32 %v2099_v20, 0.0 }
 0x18a   :  { %v2118_v23 = vmax.f32 %v2102_v42, 0.0  ;;  %v2831_v32 = vadd.f32 %v3914_v24, %v4924_v10  ;;  %v2752_v36 = vpop.f32.mrb[19].mxu1  ;;  %v2846_v61 = vmax.f32 %v2830_v38, 0.0 }
 0x18b   :  { %v2116_v48 = vmax.f32 %v2100_v29, 0.0  ;;  %v2829_v26 = vadd.f32 %v4924_v10, %v2752_v36  ;;  %v2844_v0 = vmax.f32 %v2828_v5, 0.0 }
 0x18c   :  { %v3393_v62 = vpack.c.bf16 %v2118_v23, %v2117_v51  ;;  %v2847_v54 = vmax.f32 %v2831_v32, 0.0 }
 0x18d   :  { %v3388_v37 = vpack.c.bf16 %v2116_v48, %v2115_v58  ;;  %v2845_v52 = vmax.f32 %v2829_v26, 0.0  ;;  %v3845_v7 = vpop.f32.mrb[20].mxu0 }
 0x18e   :  { %3480 = vst [vmem:[#allocation2 + $0x88] sm:$0xff] %v3393_v62   ;;  %v3433_v8 = vpack.c.bf16 %v2847_v54, %v2846_v61  ;;  %v2105_v16 = vadd.f32 %v3845_v7, %v4924_v10  ;;  %v2036_v18 = vpop.f32.mrb[21].mxu0 }
 0x18f   :  { %3389 = vst [vmem:[#allocation2 + $0x80] sm:$0xff] %v3388_v37   ;;  %v3428_v21 = vpack.c.bf16 %v2845_v52, %v2844_v0  ;;  %v3917_v27 = vpop.f32.mrb[20].mxu1  ;;  %v2103_v28 = vadd.f32 %v4924_v10, %v2036_v18  ;;  %v3846_v19 = vpop.f32.mrb[22].mxu0 }
 0x190   :  { %3488 = vst [vmem:[#allocation2 + $0xc8] sm:$0xff] %v3433_v8   ;;  %v2834_v30 = vadd.f32 %v3917_v27, %v4924_v10  ;;  %v2765_v33 = vpop.f32.mrb[21].mxu1  ;;  %v2106_v41 = vadd.f32 %v3846_v19, %v4924_v10  ;;  %v2039_v43 = vpop.f32.mrb[23].mxu0  ;;  %v2121_v39 = vmax.f32 %v2105_v16, 0.0 }
 0x191   :  { %3487 = vst [vmem:[#allocation2 + $0xc0] sm:$0xff] %v3428_v21   ;;  %v2832_v44 = vadd.f32 %v4924_v10, %v2765_v33  ;;  %v3918_v49 = vpop.f32.mrb[22].mxu1  ;;  %v2104_v55 = vadd.f32 %v4924_v10, %v2039_v43  ;;  %v2119_v57 = vmax.f32 %v2103_v28, 0.0 }
 0x192   :  { %v2122_v45 = vmax.f32 %v2106_v41, 0.0  ;;  %v2835_v56 = vadd.f32 %v3918_v49, %v4924_v10  ;;  %v2768_v25 = vpop.f32.mrb[23].mxu1  ;;  %v2850_v31 = vmax.f32 %v2834_v30, 0.0 }
 0x193   :  { %v2120_v13 = vmax.f32 %v2104_v55, 0.0  ;;  %v2833_v59 = vadd.f32 %v4924_v10, %v2768_v25  ;;  %v2848_v63 = vmax.f32 %v2832_v44, 0.0 }
 0x194   :  { %v3403_v9 = vpack.c.bf16 %v2122_v45, %v2121_v39  ;;  %v2851_v60 = vmax.f32 %v2835_v56, 0.0 }
 0x195   :  { %v3398_v3 = vpack.c.bf16 %v2120_v13, %v2119_v57  ;;  %v2849_v1 = vmax.f32 %v2833_v59, 0.0  ;;  %v3849_v50 = vpop.f32.mrb[24].mxu0 }
 0x196   :  { %3482 = vst [vmem:[#allocation2 + $0x98] sm:$0xff] %v3403_v9   ;;  %v3443_v14 = vpack.c.bf16 %v2851_v60, %v2850_v31  ;;  %v2109_v11 = vadd.f32 %v3849_v50, %v4924_v10  ;;  %v2052_v22 = vpop.f32.mrb[25].mxu0 }
 0x197   :  { %3481 = vst [vmem:[#allocation2 + $0x90] sm:$0xff] %v3398_v3   ;;  %v3438_v12 = vpack.c.bf16 %v2849_v1, %v2848_v63  ;;  %v3921_v6 = vpop.f32.mrb[24].mxu1  ;;  %v2107_v34 = vadd.f32 %v4924_v10, %v2052_v22  ;;  %v3850_v53 = vpop.f32.mrb[26].mxu0 }
 0x198   :  { %3490 = vst [vmem:[#allocation2 + $0xd8] sm:$0xff] %v3443_v14   ;;  %v2838_v46 = vadd.f32 %v3921_v6, %v4924_v10  ;;  %v2781_v35 = vpop.f32.mrb[25].mxu1  ;;  %v2110_v2 = vadd.f32 %v3850_v53, %v4924_v10  ;;  %v2055_v17 = vpop.f32.mrb[27].mxu0  ;;  %v2125_v38 = vmax.f32 %v2109_v11, 0.0 }
 0x199   :  { %3489 = vst [vmem:[#allocation2 + $0xd0] sm:$0xff] %v3438_v12   ;;  %v2836_v4 = vadd.f32 %v4924_v10, %v2781_v35  ;;  %v3922_v20 = vpop.f32.mrb[26].mxu1  ;;  %v2108_v47 = vadd.f32 %v4924_v10, %v2055_v17  ;;  %v2123_v5 = vmax.f32 %v2107_v34, 0.0 }
 0x19a   :  { %v2126_v15 = vmax.f32 %v2110_v2, 0.0  ;;  %v2839_v42 = vadd.f32 %v3922_v20, %v4924_v10  ;;  %v2784_v40 = vpop.f32.mrb[27].mxu1  ;;  %v2854_v51 = vmax.f32 %v2838_v46, 0.0 }
 0x19b   :  { %v2124_v24 = vmax.f32 %v2108_v47, 0.0  ;;  %v2837_v29 = vadd.f32 %v4924_v10, %v2784_v40  ;;  %v2852_v36 = vmax.f32 %v2836_v4, 0.0 }
 0x19c   :  { %v3413_v23 = vpack.c.bf16 %v2126_v15, %v2125_v38  ;;  %v2855_v32 = vmax.f32 %v2839_v42, 0.0 }
 0x19d   :  { %v3408_v58 = vpack.c.bf16 %v2124_v24, %v2123_v5  ;;  %v2853_v48 = vmax.f32 %v2837_v29, 0.0  ;;  %v3853_v26 = vpop.f32.mrb[28].mxu0 }
 0x19e   :  { %3484 = vst [vmem:[#allocation2 + $0xa8] sm:$0xff] %v3413_v23   ;;  %v3453_v61 = vpack.c.bf16 %v2855_v32, %v2854_v51  ;;  %v2113_v62 = vadd.f32 %v3853_v26, %v4924_v10  ;;  %v2068_v54 = vpop.f32.mrb[29].mxu0 }
 0x19f   :  { %3483 = vst [vmem:[#allocation2 + $0xa0] sm:$0xff] %v3408_v58   ;;  %v3448_v0 = vpack.c.bf16 %v2853_v48, %v2852_v36  ;;  %v3925_v37 = vpop.f32.mrb[28].mxu1  ;;  %v2111_v52 = vadd.f32 %v4924_v10, %v2068_v54  ;;  %v3854_v7 = vpop.f32.mrb[30].mxu0 }
 0x1a0   :  { %3492 = vst [vmem:[#allocation2 + $0xe8] sm:$0xff] %v3453_v61   ;;  %v2842_v8 = vadd.f32 %v3925_v37, %v4924_v10  ;;  %v2797_v16 = vpop.f32.mrb[29].mxu1  ;;  %v2114_v18 = vadd.f32 %v3854_v7, %v4924_v10  ;;  %v2071_v21 = vpop.f32.mrb[31].mxu0  ;;  %v2129_v30 = vmax.f32 %v2113_v62, 0.0 }
 0x1a1   :  { %3491 = vst [vmem:[#allocation2 + $0xe0] sm:$0xff] %v3448_v0   ;;  %v2840_v27 = vadd.f32 %v4924_v10, %v2797_v16  ;;  %v3926_v28 = vpop.f32.mrb[30].mxu1  ;;  %v2112_v19 = vadd.f32 %v4924_v10, %v2071_v21  ;;  %v2127_v44 = vmax.f32 %v2111_v52, 0.0 }
 0x1a2   :  { %v2130_v33 = vmax.f32 %v2114_v18, 0.0  ;;  %v2843_v41 = vadd.f32 %v3926_v28, %v4924_v10  ;;  %v2800_v43 = vpop.f32.mrb[31].mxu1  ;;  %v2858_v39 = vmax.f32 %v2842_v8, 0.0 }
 0x1a3   :  { %v2128_v49 = vmax.f32 %v2112_v19, 0.0  ;;  %v2841_v55 = vadd.f32 %v4924_v10, %v2800_v43  ;;  %v2856_v25 = vmax.f32 %v2840_v27, 0.0 }
 0x1a4   :  { %v3423_v45 = vpack.c.bf16 %v2130_v33, %v2129_v30  ;;  %v2859_v56 = vmax.f32 %v2843_v41, 0.0 }
 0x1a5   :  { %v3418_v57 = vpack.c.bf16 %v2128_v49, %v2127_v44  ;;  %v2857_v13 = vmax.f32 %v2841_v55, 0.0 }
 0x1a6   :  { %3486 = vst [vmem:[#allocation2 + $0xb8] sm:$0xff] %v3423_v45   ;;  %v3463_v59 = vpack.c.bf16 %v2859_v56, %v2858_v39 }
 0x1a7   :  { %3485 = vst [vmem:[#allocation2 + $0xb0] sm:$0xff] %v3418_v57   ;;  %v3458_v31 = vpack.c.bf16 %v2857_v13, %v2856_v25 }
 0x1a8   :  { %3494 = vst [vmem:[#allocation2 + $0xf8] sm:$0xff] %v3463_v59  }
 0x1a9   :  { %3493 = vst [vmem:[#allocation2 + $0xf0] sm:$0xff] %v3458_v31  }
 0x1aa   :  { %4157 = shalt.err (!%p4154_p4)
}
 0x1ab   :  { %s4158_s11 = scalar_lea.hbm %s5005_s3, 4096 }
 0x1ac   :  { %p4159_p5 = scmp.ne.s32.totalorder %s5005_s3, %s4158_s11  ;;  %p4162_p6 = scmp.lt.u32.totalorder %s4158_s11, %s5005_s3 }
 0x1ae   :  { %p4164_p7 = pnand %p4162_p6, %p4159_p5 }
 0x1b0   :  { %4167 = shalt.err (!%p4164_p7)
}
 0x1b1   :  { %s4171_s15 = smov 64   ;;  %s4172_s16 = smov 4  }
 0x1b2   :  { %2951 = dma.vmem_to_hbm [thread:$0]  %s2946_s7, 4096, %s5005_s3, [#allocation3], %s4171_s15, %s4171_s15, %s4172_s16  }
 0x1b3   :  { %4168 = dma.done.wait [#allocation3], 4096  }
 0x1b4   :  { %4169 = vsyncadd [#allocation3], 4294963200 }
 0x1b5   :  { %2955 = vsyncpa [#allocation3], 1 }

</bundles_post_ra>
